<compile_context>
chip_gen: v7x
topology: tpu7x:2x2x1
jax: 0.10.0
libtpu: 0.0.40
codegen_flags: <defaults>
</compile_context>

<pallas_src>
import functools

import jax
import jax.numpy as jnp
from jax.experimental import pallas as pl
from jax.experimental.pallas import tpu as pltpu


# ----------------------------- kernel helpers ------------------------------

def _layernorm(h, gamma, beta, eps=1e-5):
    # PyTorch nn.LayerNorm: biased variance, eps inside sqrt; keep in f32.
    mu = jnp.mean(h, axis=-1, keepdims=True)
    var = jnp.mean((h - mu) ** 2, axis=-1, keepdims=True)
    return (h - mu) * jax.lax.rsqrt(var + eps) * gamma + beta


# ------------------------------ fused kernel --------------------------------

def _make_decoder_kernel(n_heads, use_self_bias, use_cross_bias):
    """Build the fused decoder-block kernel (one batch element per grid step)."""

    def kernel(*refs):
        it = iter(refs)
        x_ref = next(it)                                  # (1, Sq, D) f32
        enc_ref = next(it)                                # (1, Se, D) f32
        sbias_ref = next(it) if use_self_bias else None   # (1, Sq, Sq) f32
        cbias_ref = next(it) if use_cross_bias else None  # (1, Sq, Se) f32
        w_qkv_ref, b_qkv_ref = next(it), next(it)         # (D,3D) bf16, (1,3D) f32
        wo1_ref, bo1_ref = next(it), next(it)
        wq2_ref, bq2_ref = next(it), next(it)
        w_kv2_ref, b_kv2_ref = next(it), next(it)
        wo2_ref, bo2_ref = next(it), next(it)
        g1_ref, be1_ref = next(it), next(it)
        g2_ref, be2_ref = next(it), next(it)
        g3_ref, be3_ref = next(it), next(it)
        wf1_ref, bf1_ref = next(it), next(it)
        wf2_ref, bf2_ref = next(it), next(it)
        o_ref = next(it)                                  # (1, Sq, D) f32
        ctx_ref = next(it)                                # VMEM scratch (Sq, D) f32

        x = x_ref[0]                  # (Sq, D) f32
        enc = enc_ref[0]              # (Se, D) f32
        D = x.shape[-1]
        dh = D // n_heads
        scale = dh ** -0.5            # python float constant

        def attend(q, k, v, bias):
            # q: (Sq, D), k/v: (Sk, D) f32; bias: (Sq, Sk) additive or None.
            for h in range(n_heads):  # static unroll; heads write scratch slices
                sl = slice(h * dh, (h + 1) * dh)
                qh = q[:, sl].astype(jnp.bfloat16)
                kh = k[:, sl].astype(jnp.bfloat16)
                vh = v[:, sl].astype(jnp.bfloat16)
                # q . k^T without an explicit transpose (NT dot_general).
                s = jax.lax.dot_general(
                    qh, kh, (((1,), (1,)), ((), ())),
                    preferred_element_type=jnp.float32) * scale
                if bias is not None:
                    s = s + bias
                s = s - jnp.max(s, axis=-1, keepdims=True)
                p = jnp.exp(s)
                p = p * pl.reciprocal(jnp.sum(p, axis=-1, keepdims=True),
                                      approx=True)
                ctx_ref[:, sl] = jnp.dot(p.astype(jnp.bfloat16), vh,
                                         preferred_element_type=jnp.float32)
            return ctx_ref[...]

        def self_attention(h_in, bias):
            hb = h_in.astype(jnp.bfloat16)
            qkv = jnp.dot(hb, w_qkv_ref[...],
                          preferred_element_type=jnp.float32) + b_qkv_ref[...]
            ctx = attend(qkv[:, :D], qkv[:, D:2 * D], qkv[:, 2 * D:], bias)
            return jnp.dot(ctx.astype(jnp.bfloat16), wo1_ref[...],
                           preferred_element_type=jnp.float32) + bo1_ref[...]

        def cross_attention(h_in, bias):
            hb = h_in.astype(jnp.bfloat16)
            eb = enc.astype(jnp.bfloat16)
            q = jnp.dot(hb, wq2_ref[...],
                        preferred_element_type=jnp.float32) + bq2_ref[...]
            kv = jnp.dot(eb, w_kv2_ref[...],
                         preferred_element_type=jnp.float32) + b_kv2_ref[...]
            ctx = attend(q, kv[:, :D], kv[:, D:], bias)
            return jnp.dot(ctx.astype(jnp.bfloat16), wo2_ref[...],
                           preferred_element_type=jnp.float32) + bo2_ref[...]

        sbias = sbias_ref[0] if use_self_bias else None
        cbias = cbias_ref[0] if use_cross_bias else None

        # self-attention + residual + LayerNorm   (dropout == identity)
        h1 = _layernorm(x + self_attention(x, sbias), g1_ref[...], be1_ref[...])
        # cross-attention + residual + LayerNorm
        h2 = _layernorm(h1 + cross_attention(h1, cbias), g2_ref[...], be2_ref[...])
        # position-wise FFN + residual + LayerNorm
        ff = jnp.dot(h2.astype(jnp.bfloat16), wf1_ref[...],
                     preferred_element_type=jnp.float32) + bf1_ref[...]
        ff = jnp.maximum(ff, 0.0)
        ff = jnp.dot(ff.astype(jnp.bfloat16), wf2_ref[...],
                     preferred_element_type=jnp.float32) + bf2_ref[...]
        o_ref[0] = _layernorm(h2 + ff, g3_ref[...], be3_ref[...])

    return kernel


# ------------------------------ wrapper --------------------------------------

def decoder_block(x, enc_out, self_mask, cross_mask, params, n_heads):
    """Full DecoderBlock forward in one fused pallas_call (eval mode)."""
    B, Sq, D = x.shape
    Se = enc_out.shape[1]
    bf16 = jnp.bfloat16

    ps, pc, pf = params["self_attn"], params["cross_attn"], params["ffn"]

    # Fold Q/K/V (and K/V) projections into single matmuls; weights -> bf16.
    w_qkv = jnp.concatenate([ps["wq"], ps["wk"], ps["wv"]], axis=1).astype(bf16)
    b_qkv = jnp.concatenate([ps["bq"], ps["bk"], ps["bv"]], axis=1)
    wo1, bo1 = ps["wo"].astype(bf16), ps["bo"]
    wq2, bq2 = pc["wq"].astype(bf16), pc["bq"]
    w_kv2 = jnp.concatenate([pc["wk"], pc["wv"]], axis=1).astype(bf16)
    b_kv2 = jnp.concatenate([pc["bk"], pc["bv"]], axis=1)
    wo2, bo2 = pc["wo"].astype(bf16), pc["bo"]
    wf1, bf1_, wf2, bf2_ = (pf["w1"].astype(bf16), pf["b1"],
                            pf["w2"].astype(bf16), pf["b2"])

    use_self_bias = self_mask is not None
    use_cross_bias = cross_mask is not None

    inputs = [x, enc_out]
    in_specs = [
        pl.BlockSpec((1, Sq, D), lambda b: (b, 0, 0)),
        pl.BlockSpec((1, Se, D), lambda b: (b, 0, 0)),
    ]
    if use_self_bias:
        inputs.append(((self_mask - 1.0) * 1e9).astype(jnp.float32))
        in_specs.append(pl.BlockSpec((1, Sq, Sq), lambda b: (b, 0, 0)))
    if use_cross_bias:
        inputs.append(((cross_mask - 1.0) * 1e9).astype(jnp.float32))
        in_specs.append(pl.BlockSpec((1, Sq, Se), lambda b: (b, 0, 0)))

    weights = [w_qkv, b_qkv, wo1, bo1, wq2, bq2, w_kv2, b_kv2, wo2, bo2,
               params["pre_norm"]["gamma"], params["pre_norm"]["beta"],
               params["cross_norm"]["gamma"], params["cross_norm"]["beta"],
               params["post_norm"]["gamma"], params["post_norm"]["beta"],
               wf1, bf1_, wf2, bf2_]
    inputs += weights
    # Constant index_map -> weights stay resident in VMEM across grid steps.
    in_specs += [pl.BlockSpec(w.shape, lambda b: (0, 0)) for w in weights]

    kernel = _make_decoder_kernel(n_heads, use_self_bias, use_cross_bias)

    return pl.pallas_call(
        kernel,
        out_shape=jax.ShapeDtypeStruct((B, Sq, D), jnp.float32),
        grid=(B,),
        in_specs=in_specs,
        out_specs=pl.BlockSpec((1, Sq, D), lambda b: (b, 0, 0)),
        scratch_shapes=[pltpu.VMEM((Sq, D), jnp.float32)],
        compiler_params=pltpu.CompilerParams(
            dimension_semantics=("parallel",)),
    )(*inputs)


# --------------------------- pure-JAX reference ------------------------------

def _ref_mha(q, k, v, mask, p, n_heads):
    B, Sq, D = q.shape
    dh = D // n_heads
    qp = q @ p["wq"] + p["bq"][0]
    kp = k @ p["wk"] + p["bk"][0]
    vp = v @ p["wv"] + p["bv"][0]

    def split(t):
        return t.reshape(B, -1, n_heads, dh).transpose(0, 2, 1, 3)   # (B,H,S,dh)

    qh, kh, vh = split(qp), split(kp), split(vp)
    s = jnp.einsum("bhqd,bhkd->bhqk", qh, kh) / jnp.sqrt(jnp.float32(dh))
    if mask is not None:
        s = jnp.where(mask[:, None, :, :] == 0.0, -1e9, s)
    p_attn = jax.nn.softmax(s, axis=-1)
    ctx = jnp.einsum("bhqk,bhkd->bhqd", p_attn, vh)
    ctx = ctx.transpose(0, 2, 1, 3).reshape(B, Sq, D)
    return ctx @ p["wo"] + p["bo"][0]


def _ref_ln(h, gamma, beta, eps=1e-5):
    mu = jnp.mean(h, axis=-1, keepdims=True)
    var = jnp.mean((h - mu) ** 2, axis=-1, keepdims=True)
    return (h - mu) / jnp.sqrt(var + eps) * gamma[0] + beta[0]


def _ref_decoder(x, enc_out, self_mask, cross_mask, params, n_heads):
    x = _ref_ln(x + _ref_mha(x, x, x, self_mask, params["self_attn"], n_heads),
                params["pre_norm"]["gamma"], params["pre_norm"]["beta"])
    x = _ref_ln(x + _ref_mha(x, enc_out, enc_out, cross_mask,
                             params["cross_attn"], n_heads),
                params["cross_norm"]["gamma"], params["cross_norm"]["beta"])
    h = jnp.maximum(x @ params["ffn"]["w1"] + params["ffn"]["b1"][0], 0.0)
    h = h @ params["ffn"]["w2"] + params["ffn"]["b2"][0]
    x = _ref_ln(x + h, params["post_norm"]["gamma"], params["post_norm"]["beta"])
    return x


# ------------------------------- main ---------------------------------------

def _init_params(key, d_model, d_ffn):
    ks = jax.random.split(key, 12)

    def lin(k, din, dout):
        return 0.05 * jax.random.normal(k, (din, dout), jnp.float32)

    def attn(ka, kb, kc, kd):
        return {
            "wq": lin(ka, d_model, d_model), "bq": jnp.zeros((1, d_model), jnp.float32),
            "wk": lin(kb, d_model, d_model), "bk": jnp.zeros((1, d_model), jnp.float32),
            "wv": lin(kc, d_model, d_model), "bv": jnp.zeros((1, d_model), jnp.float32),
            "wo": lin(kd, d_model, d_model), "bo": jnp.zeros((1, d_model), jnp.float32),
        }

    def ln():
        return {"gamma": jnp.ones((1, d_model), jnp.float32),
                "beta": jnp.zeros((1, d_model), jnp.float32)}

    return {
        "self_attn": attn(ks[0], ks[1], ks[2], ks[3]),
        "cross_attn": attn(ks[4], ks[5], ks[6], ks[7]),
        "pre_norm": ln(), "cross_norm": ln(), "post_norm": ln(),
        "ffn": {"w1": lin(ks[8], d_model, d_ffn),
                "b1": 0.05 * jax.random.normal(ks[9], (1, d_ffn), jnp.float32),
                "w2": lin(ks[10], d_ffn, d_model),
                "b2": 0.05 * jax.random.normal(ks[11], (1, d_model), jnp.float32)},
    }


if __name__ == "__main__":
    B, S_DEC, S_ENC, D_MODEL, N_HEADS, D_FFN = 2, 8, 16, 32, 4, 64

    key = jax.random.PRNGKey(0)
    k_x, k_enc, k_p = jax.random.split(key, 3)

    x = jax.random.normal(k_x, (B, S_DEC, D_MODEL), jnp.float32)
    enc_out = jax.random.normal(k_enc, (B, S_ENC, D_MODEL), jnp.float32)

    # causal self-mask (1 = keep, 0 = masked); cross mask omitted (== no mask)
    causal = jnp.tril(jnp.ones((S_DEC, S_DEC), jnp.float32))
    self_mask = jnp.broadcast_to(causal, (B, S_DEC, S_DEC))
    cross_mask = None

    params = _init_params(k_p, D_MODEL, D_FFN)

    out = decoder_block(x, enc_out, self_mask, cross_mask, params, N_HEADS)
    out = jax.block_until_ready(out)

    ref = _ref_decoder(x, enc_out, self_mask, cross_mask, params, N_HEADS)
    assert out.shape == (B, S_DEC, D_MODEL)
    # bf16 MXU operands + approx reciprocal vs a pure-f32 reference.
    assert jnp.allclose(out, ref, rtol=5e-2, atol=5e-2), \
        f"mismatch vs JAX reference (max|diff|={jnp.max(jnp.abs(out - ref))})"

    print("KERNEL_OK")
</pallas_src>

<mosaic_0001>
module attributes {stable_mosaic.version = 11 : i64} {
  func.func @kernel(%arg0: i32, %arg1: memref<1x8x32xf32, #tpu.memory_space<vmem>>, %arg2: memref<1x16x32xf32, #tpu.memory_space<vmem>>, %arg3: memref<1x8x8xf32, #tpu.memory_space<vmem>>, %arg4: memref<32x96xbf16, #tpu.memory_space<vmem>>, %arg5: memref<1x96xf32, #tpu.memory_space<vmem>>, %arg6: memref<32x32xbf16, #tpu.memory_space<vmem>>, %arg7: memref<1x32xf32, #tpu.memory_space<vmem>>, %arg8: memref<32x32xbf16, #tpu.memory_space<vmem>>, %arg9: memref<1x32xf32, #tpu.memory_space<vmem>>, %arg10: memref<32x64xbf16, #tpu.memory_space<vmem>>, %arg11: memref<1x64xf32, #tpu.memory_space<vmem>>, %arg12: memref<32x32xbf16, #tpu.memory_space<vmem>>, %arg13: memref<1x32xf32, #tpu.memory_space<vmem>>, %arg14: memref<1x32xf32, #tpu.memory_space<vmem>>, %arg15: memref<1x32xf32, #tpu.memory_space<vmem>>, %arg16: memref<1x32xf32, #tpu.memory_space<vmem>>, %arg17: memref<1x32xf32, #tpu.memory_space<vmem>>, %arg18: memref<1x32xf32, #tpu.memory_space<vmem>>, %arg19: memref<1x32xf32, #tpu.memory_space<vmem>>, %arg20: memref<32x64xbf16, #tpu.memory_space<vmem>>, %arg21: memref<1x64xf32, #tpu.memory_space<vmem>>, %arg22: memref<64x32xbf16, #tpu.memory_space<vmem>>, %arg23: memref<1x32xf32, #tpu.memory_space<vmem>>, %arg24: memref<1x8x32xf32, #tpu.memory_space<vmem>>, %arg25: memref<8x32xf32, #tpu.memory_space<vmem>>) attributes {dimension_semantics = [#tpu.dimension_semantics<parallel>], iteration_bounds = array<i64: 2>, scalar_prefetch = 0 : i64, scratch_operands = 1 : i64, tpu.core_type = #tpu.core_type<tc>, window_params = [{transform_indices = @transform_0, window_bounds = array<i64: 1, 8, 32>}, {transform_indices = @transform_1, window_bounds = array<i64: 1, 16, 32>}, {transform_indices = @transform_2, window_bounds = array<i64: 1, 8, 8>}, {pipeline_mode = #tpu.pipeline_mode<synchronous>, transform_indices = @transform_3, window_bounds = array<i64: 32, 96>}, {pipeline_mode = #tpu.pipeline_mode<synchronous>, transform_indices = @transform_4, window_bounds = array<i64: 1, 96>}, {pipeline_mode = #tpu.pipeline_mode<synchronous>, transform_indices = @transform_5, window_bounds = array<i64: 32, 32>}, {pipeline_mode = #tpu.pipeline_mode<synchronous>, transform_indices = @transform_6, window_bounds = array<i64: 1, 32>}, {pipeline_mode = #tpu.pipeline_mode<synchronous>, transform_indices = @transform_7, window_bounds = array<i64: 32, 32>}, {pipeline_mode = #tpu.pipeline_mode<synchronous>, transform_indices = @transform_8, window_bounds = array<i64: 1, 32>}, {pipeline_mode = #tpu.pipeline_mode<synchronous>, transform_indices = @transform_9, window_bounds = array<i64: 32, 64>}, {pipeline_mode = #tpu.pipeline_mode<synchronous>, transform_indices = @transform_10, window_bounds = array<i64: 1, 64>}, {pipeline_mode = #tpu.pipeline_mode<synchronous>, transform_indices = @transform_11, window_bounds = array<i64: 32, 32>}, {pipeline_mode = #tpu.pipeline_mode<synchronous>, transform_indices = @transform_12, window_bounds = array<i64: 1, 32>}, {pipeline_mode = #tpu.pipeline_mode<synchronous>, transform_indices = @transform_13, window_bounds = array<i64: 1, 32>}, {pipeline_mode = #tpu.pipeline_mode<synchronous>, transform_indices = @transform_14, window_bounds = array<i64: 1, 32>}, {pipeline_mode = #tpu.pipeline_mode<synchronous>, transform_indices = @transform_15, window_bounds = array<i64: 1, 32>}, {pipeline_mode = #tpu.pipeline_mode<synchronous>, transform_indices = @transform_16, window_bounds = array<i64: 1, 32>}, {pipeline_mode = #tpu.pipeline_mode<synchronous>, transform_indices = @transform_17, window_bounds = array<i64: 1, 32>}, {pipeline_mode = #tpu.pipeline_mode<synchronous>, transform_indices = @transform_18, window_bounds = array<i64: 1, 32>}, {pipeline_mode = #tpu.pipeline_mode<synchronous>, transform_indices = @transform_19, window_bounds = array<i64: 32, 64>}, {pipeline_mode = #tpu.pipeline_mode<synchronous>, transform_indices = @transform_20, window_bounds = array<i64: 1, 64>}, {pipeline_mode = #tpu.pipeline_mode<synchronous>, transform_indices = @transform_21, window_bounds = array<i64: 64, 32>}, {pipeline_mode = #tpu.pipeline_mode<synchronous>, transform_indices = @transform_22, window_bounds = array<i64: 1, 32>}, {transform_indices = @transform_23, window_bounds = array<i64: 1, 8, 32>}]} {
    %c0 = arith.constant 0 : index
    %c0_0 = arith.constant 0 : index
    %c0_1 = arith.constant 0 : index
    %0 = vector.load %arg1[%c0, %c0_0, %c0_1] : memref<1x8x32xf32, #tpu.memory_space<vmem>>, vector<1x8x32xf32>
    %1 = vector.shape_cast %0 : vector<1x8x32xf32> to vector<8x32xf32>
    %c0_2 = arith.constant 0 : index
    %c0_3 = arith.constant 0 : index
    %c0_4 = arith.constant 0 : index
    %2 = vector.load %arg2[%c0_2, %c0_3, %c0_4] : memref<1x16x32xf32, #tpu.memory_space<vmem>>, vector<1x16x32xf32>
    %3 = vector.shape_cast %2 : vector<1x16x32xf32> to vector<16x32xf32>
    %c0_5 = arith.constant 0 : index
    %c0_6 = arith.constant 0 : index
    %c0_7 = arith.constant 0 : index
    %4 = vector.load %arg3[%c0_5, %c0_6, %c0_7] : memref<1x8x8xf32, #tpu.memory_space<vmem>>, vector<1x8x8xf32>
    %5 = vector.shape_cast %4 : vector<1x8x8xf32> to vector<8x8xf32>
    %6 = arith.truncf %1 : vector<8x32xf32> to vector<8x32xbf16>
    %c0_8 = arith.constant 0 : index
    %c0_9 = arith.constant 0 : index
    %7 = vector.load %arg4[%c0_8, %c0_9] : memref<32x96xbf16, #tpu.memory_space<vmem>>, vector<32x96xbf16>
    %cst = arith.constant dense<0.000000e+00> : vector<8x96xf32>
    %8 = tpu.matmul %6, %7, %cst {dimension_numbers = #tpu.dot_dimension_numbers<[1], [0], [0], [1], [0, 0, 1, 1], [], []>} : vector<8x32xbf16>, vector<32x96xbf16>, vector<8x96xf32> -> vector<8x96xf32>
    %c0_10 = arith.constant 0 : index
    %c0_11 = arith.constant 0 : index
    %9 = vector.load %arg5[%c0_10, %c0_11] : memref<1x96xf32, #tpu.memory_space<vmem>>, vector<1x96xf32>
    %10 = vector.broadcast %9 : vector<1x96xf32> to vector<8x96xf32>
    %11 = arith.addf %8, %10 : vector<8x96xf32>
    %12 = vector.extract_strided_slice %11 {offsets = [0, 0], sizes = [8, 32], strides = [1, 1]} : vector<8x96xf32> to vector<8x32xf32>
    %13 = vector.extract_strided_slice %11 {offsets = [0, 32], sizes = [8, 32], strides = [1, 1]} : vector<8x96xf32> to vector<8x32xf32>
    %14 = vector.extract_strided_slice %11 {offsets = [0, 64], sizes = [8, 32], strides = [1, 1]} : vector<8x96xf32> to vector<8x32xf32>
    %15 = vector.extract_strided_slice %12 {offsets = [0, 0], sizes = [8, 8], strides = [1, 1]} : vector<8x32xf32> to vector<8x8xf32>
    %16 = arith.truncf %15 : vector<8x8xf32> to vector<8x8xbf16>
    %17 = vector.extract_strided_slice %13 {offsets = [0, 0], sizes = [8, 8], strides = [1, 1]} : vector<8x32xf32> to vector<8x8xf32>
    %18 = arith.truncf %17 : vector<8x8xf32> to vector<8x8xbf16>
    %19 = vector.extract_strided_slice %14 {offsets = [0, 0], sizes = [8, 8], strides = [1, 1]} : vector<8x32xf32> to vector<8x8xf32>
    %20 = arith.truncf %19 : vector<8x8xf32> to vector<8x8xbf16>
    %cst_12 = arith.constant dense<0.000000e+00> : vector<8x8xf32>
    %21 = tpu.matmul %16, %18, %cst_12 {dimension_numbers = #tpu.dot_dimension_numbers<[1], [1], [0], [0], [0, 0, 1, 0], [], []>} : vector<8x8xbf16>, vector<8x8xbf16>, vector<8x8xf32> -> vector<8x8xf32>
    %cst_13 = arith.constant 0.353553385 : f32
    %22 = vector.broadcast %cst_13 : f32 to vector<8x8xf32>
    %23 = arith.mulf %21, %22 : vector<8x8xf32>
    %24 = arith.addf %23, %5 : vector<8x8xf32>
    %cst_14 = arith.constant dense<0xFF800000> : vector<8xf32>
    %25 = vector.multi_reduction <maximumf>, %24, %cst_14 [1] : vector<8x8xf32> to vector<8xf32>
    %26 = vector.shape_cast %25 : vector<8xf32> to vector<8x1xf32>
    %27 = vector.broadcast %26 : vector<8x1xf32> to vector<8x8xf32>
    %28 = arith.subf %24, %27 : vector<8x8xf32>
    %29 = math.exp %28 : vector<8x8xf32>
    %cst_15 = arith.constant dense<0.000000e+00> : vector<8xf32>
    %30 = vector.multi_reduction <add>, %29, %cst_15 [1] : vector<8x8xf32> to vector<8xf32>
    %31 = vector.shape_cast %30 : vector<8xf32> to vector<8x1xf32>
    %32 = tpu.reciprocal %31 {approx = true} : vector<8x1xf32> -> vector<8x1xf32>
    %33 = vector.broadcast %32 : vector<8x1xf32> to vector<8x8xf32>
    %34 = arith.mulf %29, %33 : vector<8x8xf32>
    %35 = arith.truncf %34 : vector<8x8xf32> to vector<8x8xbf16>
    %cst_16 = arith.constant dense<0.000000e+00> : vector<8x8xf32>
    %36 = tpu.matmul %35, %20, %cst_16 {dimension_numbers = #tpu.dot_dimension_numbers<[1], [0], [0], [1], [0, 0, 1, 1], [], []>} : vector<8x8xbf16>, vector<8x8xbf16>, vector<8x8xf32> -> vector<8x8xf32>
    %c0_17 = arith.constant 0 : index
    %c0_18 = arith.constant 0 : index
    %37 = vector.load %arg25[%c0_17, %c0_18] : memref<8x32xf32, #tpu.memory_space<vmem>>, vector<8x8xf32>
    tpu.vector_store %arg25[%c0_17, %c0_18], %36 {strides = array<i32>} : memref<8x32xf32, #tpu.memory_space<vmem>>, vector<8x8xf32>,
    %38 = vector.extract_strided_slice %12 {offsets = [0, 8], sizes = [8, 8], strides = [1, 1]} : vector<8x32xf32> to vector<8x8xf32>
    %39 = arith.truncf %38 : vector<8x8xf32> to vector<8x8xbf16>
    %40 = vector.extract_strided_slice %13 {offsets = [0, 8], sizes = [8, 8], strides = [1, 1]} : vector<8x32xf32> to vector<8x8xf32>
    %41 = arith.truncf %40 : vector<8x8xf32> to vector<8x8xbf16>
    %42 = vector.extract_strided_slice %14 {offsets = [0, 8], sizes = [8, 8], strides = [1, 1]} : vector<8x32xf32> to vector<8x8xf32>
    %43 = arith.truncf %42 : vector<8x8xf32> to vector<8x8xbf16>
    %cst_19 = arith.constant dense<0.000000e+00> : vector<8x8xf32>
    %44 = tpu.matmul %39, %41, %cst_19 {dimension_numbers = #tpu.dot_dimension_numbers<[1], [1], [0], [0], [0, 0, 1, 0], [], []>} : vector<8x8xbf16>, vector<8x8xbf16>, vector<8x8xf32> -> vector<8x8xf32>
    %cst_20 = arith.constant 0.353553385 : f32
    %45 = vector.broadcast %cst_20 : f32 to vector<8x8xf32>
    %46 = arith.mulf %44, %45 : vector<8x8xf32>
    %47 = arith.addf %46, %5 : vector<8x8xf32>
    %cst_21 = arith.constant dense<0xFF800000> : vector<8xf32>
    %48 = vector.multi_reduction <maximumf>, %47, %cst_21 [1] : vector<8x8xf32> to vector<8xf32>
    %49 = vector.shape_cast %48 : vector<8xf32> to vector<8x1xf32>
    %50 = vector.broadcast %49 : vector<8x1xf32> to vector<8x8xf32>
    %51 = arith.subf %47, %50 : vector<8x8xf32>
    %52 = math.exp %51 : vector<8x8xf32>
    %cst_22 = arith.constant dense<0.000000e+00> : vector<8xf32>
    %53 = vector.multi_reduction <add>, %52, %cst_22 [1] : vector<8x8xf32> to vector<8xf32>
    %54 = vector.shape_cast %53 : vector<8xf32> to vector<8x1xf32>
    %55 = tpu.reciprocal %54 {approx = true} : vector<8x1xf32> -> vector<8x1xf32>
    %56 = vector.broadcast %55 : vector<8x1xf32> to vector<8x8xf32>
    %57 = arith.mulf %52, %56 : vector<8x8xf32>
    %58 = arith.truncf %57 : vector<8x8xf32> to vector<8x8xbf16>
    %cst_23 = arith.constant dense<0.000000e+00> : vector<8x8xf32>
    %59 = tpu.matmul %58, %43, %cst_23 {dimension_numbers = #tpu.dot_dimension_numbers<[1], [0], [0], [1], [0, 0, 1, 1], [], []>} : vector<8x8xbf16>, vector<8x8xbf16>, vector<8x8xf32> -> vector<8x8xf32>
    %c0_24 = arith.constant 0 : index
    %c8 = arith.constant 8 : index
    %60 = vector.load %arg25[%c0_24, %c8] : memref<8x32xf32, #tpu.memory_space<vmem>>, vector<8x8xf32>
    tpu.vector_store %arg25[%c0_24, %c8], %59 {strides = array<i32>} : memref<8x32xf32, #tpu.memory_space<vmem>>, vector<8x8xf32>,
    %61 = vector.extract_strided_slice %12 {offsets = [0, 16], sizes = [8, 8], strides = [1, 1]} : vector<8x32xf32> to vector<8x8xf32>
    %62 = arith.truncf %61 : vector<8x8xf32> to vector<8x8xbf16>
    %63 = vector.extract_strided_slice %13 {offsets = [0, 16], sizes = [8, 8], strides = [1, 1]} : vector<8x32xf32> to vector<8x8xf32>
    %64 = arith.truncf %63 : vector<8x8xf32> to vector<8x8xbf16>
    %65 = vector.extract_strided_slice %14 {offsets = [0, 16], sizes = [8, 8], strides = [1, 1]} : vector<8x32xf32> to vector<8x8xf32>
    %66 = arith.truncf %65 : vector<8x8xf32> to vector<8x8xbf16>
    %cst_25 = arith.constant dense<0.000000e+00> : vector<8x8xf32>
    %67 = tpu.matmul %62, %64, %cst_25 {dimension_numbers = #tpu.dot_dimension_numbers<[1], [1], [0], [0], [0, 0, 1, 0], [], []>} : vector<8x8xbf16>, vector<8x8xbf16>, vector<8x8xf32> -> vector<8x8xf32>
    %cst_26 = arith.constant 0.353553385 : f32
    %68 = vector.broadcast %cst_26 : f32 to vector<8x8xf32>
    %69 = arith.mulf %67, %68 : vector<8x8xf32>
    %70 = arith.addf %69, %5 : vector<8x8xf32>
    %cst_27 = arith.constant dense<0xFF800000> : vector<8xf32>
    %71 = vector.multi_reduction <maximumf>, %70, %cst_27 [1] : vector<8x8xf32> to vector<8xf32>
    %72 = vector.shape_cast %71 : vector<8xf32> to vector<8x1xf32>
    %73 = vector.broadcast %72 : vector<8x1xf32> to vector<8x8xf32>
    %74 = arith.subf %70, %73 : vector<8x8xf32>
    %75 = math.exp %74 : vector<8x8xf32>
    %cst_28 = arith.constant dense<0.000000e+00> : vector<8xf32>
    %76 = vector.multi_reduction <add>, %75, %cst_28 [1] : vector<8x8xf32> to vector<8xf32>
    %77 = vector.shape_cast %76 : vector<8xf32> to vector<8x1xf32>
    %78 = tpu.reciprocal %77 {approx = true} : vector<8x1xf32> -> vector<8x1xf32>
    %79 = vector.broadcast %78 : vector<8x1xf32> to vector<8x8xf32>
    %80 = arith.mulf %75, %79 : vector<8x8xf32>
    %81 = arith.truncf %80 : vector<8x8xf32> to vector<8x8xbf16>
    %cst_29 = arith.constant dense<0.000000e+00> : vector<8x8xf32>
    %82 = tpu.matmul %81, %66, %cst_29 {dimension_numbers = #tpu.dot_dimension_numbers<[1], [0], [0], [1], [0, 0, 1, 1], [], []>} : vector<8x8xbf16>, vector<8x8xbf16>, vector<8x8xf32> -> vector<8x8xf32>
    %c0_30 = arith.constant 0 : index
    %c16 = arith.constant 16 : index
    %83 = vector.load %arg25[%c0_30, %c16] : memref<8x32xf32, #tpu.memory_space<vmem>>, vector<8x8xf32>
    tpu.vector_store %arg25[%c0_30, %c16], %82 {strides = array<i32>} : memref<8x32xf32, #tpu.memory_space<vmem>>, vector<8x8xf32>,
    %84 = vector.extract_strided_slice %12 {offsets = [0, 24], sizes = [8, 8], strides = [1, 1]} : vector<8x32xf32> to vector<8x8xf32>
    %85 = arith.truncf %84 : vector<8x8xf32> to vector<8x8xbf16>
    %86 = vector.extract_strided_slice %13 {offsets = [0, 24], sizes = [8, 8], strides = [1, 1]} : vector<8x32xf32> to vector<8x8xf32>
    %87 = arith.truncf %86 : vector<8x8xf32> to vector<8x8xbf16>
    %88 = vector.extract_strided_slice %14 {offsets = [0, 24], sizes = [8, 8], strides = [1, 1]} : vector<8x32xf32> to vector<8x8xf32>
    %89 = arith.truncf %88 : vector<8x8xf32> to vector<8x8xbf16>
    %cst_31 = arith.constant dense<0.000000e+00> : vector<8x8xf32>
    %90 = tpu.matmul %85, %87, %cst_31 {dimension_numbers = #tpu.dot_dimension_numbers<[1], [1], [0], [0], [0, 0, 1, 0], [], []>} : vector<8x8xbf16>, vector<8x8xbf16>, vector<8x8xf32> -> vector<8x8xf32>
    %cst_32 = arith.constant 0.353553385 : f32
    %91 = vector.broadcast %cst_32 : f32 to vector<8x8xf32>
    %92 = arith.mulf %90, %91 : vector<8x8xf32>
    %93 = arith.addf %92, %5 : vector<8x8xf32>
    %cst_33 = arith.constant dense<0xFF800000> : vector<8xf32>
    %94 = vector.multi_reduction <maximumf>, %93, %cst_33 [1] : vector<8x8xf32> to vector<8xf32>
    %95 = vector.shape_cast %94 : vector<8xf32> to vector<8x1xf32>
    %96 = vector.broadcast %95 : vector<8x1xf32> to vector<8x8xf32>
    %97 = arith.subf %93, %96 : vector<8x8xf32>
    %98 = math.exp %97 : vector<8x8xf32>
    %cst_34 = arith.constant dense<0.000000e+00> : vector<8xf32>
    %99 = vector.multi_reduction <add>, %98, %cst_34 [1] : vector<8x8xf32> to vector<8xf32>
    %100 = vector.shape_cast %99 : vector<8xf32> to vector<8x1xf32>
    %101 = tpu.reciprocal %100 {approx = true} : vector<8x1xf32> -> vector<8x1xf32>
    %102 = vector.broadcast %101 : vector<8x1xf32> to vector<8x8xf32>
    %103 = arith.mulf %98, %102 : vector<8x8xf32>
    %104 = arith.truncf %103 : vector<8x8xf32> to vector<8x8xbf16>
    %cst_35 = arith.constant dense<0.000000e+00> : vector<8x8xf32>
    %105 = tpu.matmul %104, %89, %cst_35 {dimension_numbers = #tpu.dot_dimension_numbers<[1], [0], [0], [1], [0, 0, 1, 1], [], []>} : vector<8x8xbf16>, vector<8x8xbf16>, vector<8x8xf32> -> vector<8x8xf32>
    %c0_36 = arith.constant 0 : index
    %c24 = arith.constant 24 : index
    %106 = vector.load %arg25[%c0_36, %c24] : memref<8x32xf32, #tpu.memory_space<vmem>>, vector<8x8xf32>
    tpu.vector_store %arg25[%c0_36, %c24], %105 {strides = array<i32>} : memref<8x32xf32, #tpu.memory_space<vmem>>, vector<8x8xf32>,
    %c0_37 = arith.constant 0 : index
    %c0_38 = arith.constant 0 : index
    %107 = vector.load %arg25[%c0_37, %c0_38] : memref<8x32xf32, #tpu.memory_space<vmem>>, vector<8x32xf32>
    %108 = arith.truncf %107 : vector<8x32xf32> to vector<8x32xbf16>
    %c0_39 = arith.constant 0 : index
    %c0_40 = arith.constant 0 : index
    %109 = vector.load %arg6[%c0_39, %c0_40] : memref<32x32xbf16, #tpu.memory_space<vmem>>, vector<32x32xbf16>
    %cst_41 = arith.constant dense<0.000000e+00> : vector<8x32xf32>
    %110 = tpu.matmul %108, %109, %cst_41 {dimension_numbers = #tpu.dot_dimension_numbers<[1], [0], [0], [1], [0, 0, 1, 1], [], []>} : vector<8x32xbf16>, vector<32x32xbf16>, vector<8x32xf32> -> vector<8x32xf32>
    %c0_42 = arith.constant 0 : index
    %c0_43 = arith.constant 0 : index
    %111 = vector.load %arg7[%c0_42, %c0_43] : memref<1x32xf32, #tpu.memory_space<vmem>>, vector<1x32xf32>
    %112 = vector.broadcast %111 : vector<1x32xf32> to vector<8x32xf32>
    %113 = arith.addf %110, %112 : vector<8x32xf32>
    %114 = arith.addf %1, %113 : vector<8x32xf32>
    %c0_44 = arith.constant 0 : index
    %c0_45 = arith.constant 0 : index
    %115 = vector.load %arg14[%c0_44, %c0_45] : memref<1x32xf32, #tpu.memory_space<vmem>>, vector<1x32xf32>
    %c0_46 = arith.constant 0 : index
    %c0_47 = arith.constant 0 : index
    %116 = vector.load %arg15[%c0_46, %c0_47] : memref<1x32xf32, #tpu.memory_space<vmem>>, vector<1x32xf32>
    %cst_48 = arith.constant dense<0.000000e+00> : vector<8xf32>
    %117 = vector.multi_reduction <add>, %114, %cst_48 [1] : vector<8x32xf32> to vector<8xf32>
    %118 = vector.shape_cast %117 : vector<8xf32> to vector<8x1xf32>
    %cst_49 = arith.constant 3.200000e+01 : f32
    %119 = vector.broadcast %cst_49 : f32 to vector<8x1xf32>
    %120 = arith.divf %118, %119 : vector<8x1xf32>
    %121 = vector.broadcast %120 : vector<8x1xf32> to vector<8x32xf32>
    %122 = arith.subf %114, %121 : vector<8x32xf32>
    %123 = arith.mulf %122, %122 : vector<8x32xf32>
    %cst_50 = arith.constant dense<0.000000e+00> : vector<8xf32>
    %124 = vector.multi_reduction <add>, %123, %cst_50 [1] : vector<8x32xf32> to vector<8xf32>
    %125 = vector.shape_cast %124 : vector<8xf32> to vector<8x1xf32>
    %cst_51 = arith.constant 3.200000e+01 : f32
    %126 = vector.broadcast %cst_51 : f32 to vector<8x1xf32>
    %127 = arith.divf %125, %126 : vector<8x1xf32>
    %128 = vector.broadcast %120 : vector<8x1xf32> to vector<8x32xf32>
    %129 = arith.subf %114, %128 : vector<8x32xf32>
    %cst_52 = arith.constant 9.99999974E-6 : f32
    %130 = vector.broadcast %cst_52 : f32 to vector<8x1xf32>
    %131 = arith.addf %127, %130 : vector<8x1xf32>
    %132 = math.rsqrt %131 : vector<8x1xf32>
    %133 = vector.broadcast %132 : vector<8x1xf32> to vector<8x32xf32>
    %134 = arith.mulf %129, %133 : vector<8x32xf32>
    %135 = vector.broadcast %115 : vector<1x32xf32> to vector<8x32xf32>
    %136 = arith.mulf %134, %135 : vector<8x32xf32>
    %137 = vector.broadcast %116 : vector<1x32xf32> to vector<8x32xf32>
    %138 = arith.addf %136, %137 : vector<8x32xf32>
    %139 = arith.truncf %138 : vector<8x32xf32> to vector<8x32xbf16>
    %140 = arith.truncf %3 : vector<16x32xf32> to vector<16x32xbf16>
    %c0_53 = arith.constant 0 : index
    %c0_54 = arith.constant 0 : index
    %141 = vector.load %arg8[%c0_53, %c0_54] : memref<32x32xbf16, #tpu.memory_space<vmem>>, vector<32x32xbf16>
    %cst_55 = arith.constant dense<0.000000e+00> : vector<8x32xf32>
    %142 = tpu.matmul %139, %141, %cst_55 {dimension_numbers = #tpu.dot_dimension_numbers<[1], [0], [0], [1], [0, 0, 1, 1], [], []>} : vector<8x32xbf16>, vector<32x32xbf16>, vector<8x32xf32> -> vector<8x32xf32>
    %c0_56 = arith.constant 0 : index
    %c0_57 = arith.constant 0 : index
    %143 = vector.load %arg9[%c0_56, %c0_57] : memref<1x32xf32, #tpu.memory_space<vmem>>, vector<1x32xf32>
    %144 = vector.broadcast %143 : vector<1x32xf32> to vector<8x32xf32>
    %145 = arith.addf %142, %144 : vector<8x32xf32>
    %c0_58 = arith.constant 0 : index
    %c0_59 = arith.constant 0 : index
    %146 = vector.load %arg10[%c0_58, %c0_59] : memref<32x64xbf16, #tpu.memory_space<vmem>>, vector<32x64xbf16>
    %cst_60 = arith.constant dense<0.000000e+00> : vector<16x64xf32>
    %147 = tpu.matmul %140, %146, %cst_60 {dimension_numbers = #tpu.dot_dimension_numbers<[1], [0], [0], [1], [0, 0, 1, 1], [], []>} : vector<16x32xbf16>, vector<32x64xbf16>, vector<16x64xf32> -> vector<16x64xf32>
    %c0_61 = arith.constant 0 : index
    %c0_62 = arith.constant 0 : index
    %148 = vector.load %arg11[%c0_61, %c0_62] : memref<1x64xf32, #tpu.memory_space<vmem>>, vector<1x64xf32>
    %149 = vector.broadcast %148 : vector<1x64xf32> to vector<16x64xf32>
    %150 = arith.addf %147, %149 : vector<16x64xf32>
    %151 = vector.extract_strided_slice %150 {offsets = [0, 0], sizes = [16, 32], strides = [1, 1]} : vector<16x64xf32> to vector<16x32xf32>
    %152 = vector.extract_strided_slice %150 {offsets = [0, 32], sizes = [16, 32], strides = [1, 1]} : vector<16x64xf32> to vector<16x32xf32>
    %153 = vector.extract_strided_slice %145 {offsets = [0, 0], sizes = [8, 8], strides = [1, 1]} : vector<8x32xf32> to vector<8x8xf32>
    %154 = arith.truncf %153 : vector<8x8xf32> to vector<8x8xbf16>
    %155 = vector.extract_strided_slice %151 {offsets = [0, 0], sizes = [16, 8], strides = [1, 1]} : vector<16x32xf32> to vector<16x8xf32>
    %156 = arith.truncf %155 : vector<16x8xf32> to vector<16x8xbf16>
    %157 = vector.extract_strided_slice %152 {offsets = [0, 0], sizes = [16, 8], strides = [1, 1]} : vector<16x32xf32> to vector<16x8xf32>
    %158 = arith.truncf %157 : vector<16x8xf32> to vector<16x8xbf16>
    %cst_63 = arith.constant dense<0.000000e+00> : vector<8x16xf32>
    %159 = tpu.matmul %154, %156, %cst_63 {dimension_numbers = #tpu.dot_dimension_numbers<[1], [1], [0], [0], [0, 0, 1, 0], [], []>} : vector<8x8xbf16>, vector<16x8xbf16>, vector<8x16xf32> -> vector<8x16xf32>
    %cst_64 = arith.constant 0.353553385 : f32
    %160 = vector.broadcast %cst_64 : f32 to vector<8x16xf32>
    %161 = arith.mulf %159, %160 : vector<8x16xf32>
    %cst_65 = arith.constant dense<0xFF800000> : vector<8xf32>
    %162 = vector.multi_reduction <maximumf>, %161, %cst_65 [1] : vector<8x16xf32> to vector<8xf32>
    %163 = vector.shape_cast %162 : vector<8xf32> to vector<8x1xf32>
    %164 = vector.broadcast %163 : vector<8x1xf32> to vector<8x16xf32>
    %165 = arith.subf %161, %164 : vector<8x16xf32>
    %166 = math.exp %165 : vector<8x16xf32>
    %cst_66 = arith.constant dense<0.000000e+00> : vector<8xf32>
    %167 = vector.multi_reduction <add>, %166, %cst_66 [1] : vector<8x16xf32> to vector<8xf32>
    %168 = vector.shape_cast %167 : vector<8xf32> to vector<8x1xf32>
    %169 = tpu.reciprocal %168 {approx = true} : vector<8x1xf32> -> vector<8x1xf32>
    %170 = vector.broadcast %169 : vector<8x1xf32> to vector<8x16xf32>
    %171 = arith.mulf %166, %170 : vector<8x16xf32>
    %172 = arith.truncf %171 : vector<8x16xf32> to vector<8x16xbf16>
    %cst_67 = arith.constant dense<0.000000e+00> : vector<8x8xf32>
    %173 = tpu.matmul %172, %158, %cst_67 {dimension_numbers = #tpu.dot_dimension_numbers<[1], [0], [0], [1], [0, 0, 1, 1], [], []>} : vector<8x16xbf16>, vector<16x8xbf16>, vector<8x8xf32> -> vector<8x8xf32>
    %c0_68 = arith.constant 0 : index
    %c0_69 = arith.constant 0 : index
    %174 = vector.load %arg25[%c0_68, %c0_69] : memref<8x32xf32, #tpu.memory_space<vmem>>, vector<8x8xf32>
    tpu.vector_store %arg25[%c0_68, %c0_69], %173 {strides = array<i32>} : memref<8x32xf32, #tpu.memory_space<vmem>>, vector<8x8xf32>,
    %175 = vector.extract_strided_slice %145 {offsets = [0, 8], sizes = [8, 8], strides = [1, 1]} : vector<8x32xf32> to vector<8x8xf32>
    %176 = arith.truncf %175 : vector<8x8xf32> to vector<8x8xbf16>
    %177 = vector.extract_strided_slice %151 {offsets = [0, 8], sizes = [16, 8], strides = [1, 1]} : vector<16x32xf32> to vector<16x8xf32>
    %178 = arith.truncf %177 : vector<16x8xf32> to vector<16x8xbf16>
    %179 = vector.extract_strided_slice %152 {offsets = [0, 8], sizes = [16, 8], strides = [1, 1]} : vector<16x32xf32> to vector<16x8xf32>
    %180 = arith.truncf %179 : vector<16x8xf32> to vector<16x8xbf16>
    %cst_70 = arith.constant dense<0.000000e+00> : vector<8x16xf32>
    %181 = tpu.matmul %176, %178, %cst_70 {dimension_numbers = #tpu.dot_dimension_numbers<[1], [1], [0], [0], [0, 0, 1, 0], [], []>} : vector<8x8xbf16>, vector<16x8xbf16>, vector<8x16xf32> -> vector<8x16xf32>
    %cst_71 = arith.constant 0.353553385 : f32
    %182 = vector.broadcast %cst_71 : f32 to vector<8x16xf32>
    %183 = arith.mulf %181, %182 : vector<8x16xf32>
    %cst_72 = arith.constant dense<0xFF800000> : vector<8xf32>
    %184 = vector.multi_reduction <maximumf>, %183, %cst_72 [1] : vector<8x16xf32> to vector<8xf32>
    %185 = vector.shape_cast %184 : vector<8xf32> to vector<8x1xf32>
    %186 = vector.broadcast %185 : vector<8x1xf32> to vector<8x16xf32>
    %187 = arith.subf %183, %186 : vector<8x16xf32>
    %188 = math.exp %187 : vector<8x16xf32>
    %cst_73 = arith.constant dense<0.000000e+00> : vector<8xf32>
    %189 = vector.multi_reduction <add>, %188, %cst_73 [1] : vector<8x16xf32> to vector<8xf32>
    %190 = vector.shape_cast %189 : vector<8xf32> to vector<8x1xf32>
    %191 = tpu.reciprocal %190 {approx = true} : vector<8x1xf32> -> vector<8x1xf32>
    %192 = vector.broadcast %191 : vector<8x1xf32> to vector<8x16xf32>
    %193 = arith.mulf %188, %192 : vector<8x16xf32>
    %194 = arith.truncf %193 : vector<8x16xf32> to vector<8x16xbf16>
    %cst_74 = arith.constant dense<0.000000e+00> : vector<8x8xf32>
    %195 = tpu.matmul %194, %180, %cst_74 {dimension_numbers = #tpu.dot_dimension_numbers<[1], [0], [0], [1], [0, 0, 1, 1], [], []>} : vector<8x16xbf16>, vector<16x8xbf16>, vector<8x8xf32> -> vector<8x8xf32>
    %c0_75 = arith.constant 0 : index
    %c8_76 = arith.constant 8 : index
    %196 = vector.load %arg25[%c0_75, %c8_76] : memref<8x32xf32, #tpu.memory_space<vmem>>, vector<8x8xf32>
    tpu.vector_store %arg25[%c0_75, %c8_76], %195 {strides = array<i32>} : memref<8x32xf32, #tpu.memory_space<vmem>>, vector<8x8xf32>,
    %197 = vector.extract_strided_slice %145 {offsets = [0, 16], sizes = [8, 8], strides = [1, 1]} : vector<8x32xf32> to vector<8x8xf32>
    %198 = arith.truncf %197 : vector<8x8xf32> to vector<8x8xbf16>
    %199 = vector.extract_strided_slice %151 {offsets = [0, 16], sizes = [16, 8], strides = [1, 1]} : vector<16x32xf32> to vector<16x8xf32>
    %200 = arith.truncf %199 : vector<16x8xf32> to vector<16x8xbf16>
    %201 = vector.extract_strided_slice %152 {offsets = [0, 16], sizes = [16, 8], strides = [1, 1]} : vector<16x32xf32> to vector<16x8xf32>
    %202 = arith.truncf %201 : vector<16x8xf32> to vector<16x8xbf16>
    %cst_77 = arith.constant dense<0.000000e+00> : vector<8x16xf32>
    %203 = tpu.matmul %198, %200, %cst_77 {dimension_numbers = #tpu.dot_dimension_numbers<[1], [1], [0], [0], [0, 0, 1, 0], [], []>} : vector<8x8xbf16>, vector<16x8xbf16>, vector<8x16xf32> -> vector<8x16xf32>
    %cst_78 = arith.constant 0.353553385 : f32
    %204 = vector.broadcast %cst_78 : f32 to vector<8x16xf32>
    %205 = arith.mulf %203, %204 : vector<8x16xf32>
    %cst_79 = arith.constant dense<0xFF800000> : vector<8xf32>
    %206 = vector.multi_reduction <maximumf>, %205, %cst_79 [1] : vector<8x16xf32> to vector<8xf32>
    %207 = vector.shape_cast %206 : vector<8xf32> to vector<8x1xf32>
    %208 = vector.broadcast %207 : vector<8x1xf32> to vector<8x16xf32>
    %209 = arith.subf %205, %208 : vector<8x16xf32>
    %210 = math.exp %209 : vector<8x16xf32>
    %cst_80 = arith.constant dense<0.000000e+00> : vector<8xf32>
    %211 = vector.multi_reduction <add>, %210, %cst_80 [1] : vector<8x16xf32> to vector<8xf32>
    %212 = vector.shape_cast %211 : vector<8xf32> to vector<8x1xf32>
    %213 = tpu.reciprocal %212 {approx = true} : vector<8x1xf32> -> vector<8x1xf32>
    %214 = vector.broadcast %213 : vector<8x1xf32> to vector<8x16xf32>
    %215 = arith.mulf %210, %214 : vector<8x16xf32>
    %216 = arith.truncf %215 : vector<8x16xf32> to vector<8x16xbf16>
    %cst_81 = arith.constant dense<0.000000e+00> : vector<8x8xf32>
    %217 = tpu.matmul %216, %202, %cst_81 {dimension_numbers = #tpu.dot_dimension_numbers<[1], [0], [0], [1], [0, 0, 1, 1], [], []>} : vector<8x16xbf16>, vector<16x8xbf16>, vector<8x8xf32> -> vector<8x8xf32>
    %c0_82 = arith.constant 0 : index
    %c16_83 = arith.constant 16 : index
    %218 = vector.load %arg25[%c0_82, %c16_83] : memref<8x32xf32, #tpu.memory_space<vmem>>, vector<8x8xf32>
    tpu.vector_store %arg25[%c0_82, %c16_83], %217 {strides = array<i32>} : memref<8x32xf32, #tpu.memory_space<vmem>>, vector<8x8xf32>,
    %219 = vector.extract_strided_slice %145 {offsets = [0, 24], sizes = [8, 8], strides = [1, 1]} : vector<8x32xf32> to vector<8x8xf32>
    %220 = arith.truncf %219 : vector<8x8xf32> to vector<8x8xbf16>
    %221 = vector.extract_strided_slice %151 {offsets = [0, 24], sizes = [16, 8], strides = [1, 1]} : vector<16x32xf32> to vector<16x8xf32>
    %222 = arith.truncf %221 : vector<16x8xf32> to vector<16x8xbf16>
    %223 = vector.extract_strided_slice %152 {offsets = [0, 24], sizes = [16, 8], strides = [1, 1]} : vector<16x32xf32> to vector<16x8xf32>
    %224 = arith.truncf %223 : vector<16x8xf32> to vector<16x8xbf16>
    %cst_84 = arith.constant dense<0.000000e+00> : vector<8x16xf32>
    %225 = tpu.matmul %220, %222, %cst_84 {dimension_numbers = #tpu.dot_dimension_numbers<[1], [1], [0], [0], [0, 0, 1, 0], [], []>} : vector<8x8xbf16>, vector<16x8xbf16>, vector<8x16xf32> -> vector<8x16xf32>
    %cst_85 = arith.constant 0.353553385 : f32
    %226 = vector.broadcast %cst_85 : f32 to vector<8x16xf32>
    %227 = arith.mulf %225, %226 : vector<8x16xf32>
    %cst_86 = arith.constant dense<0xFF800000> : vector<8xf32>
    %228 = vector.multi_reduction <maximumf>, %227, %cst_86 [1] : vector<8x16xf32> to vector<8xf32>
    %229 = vector.shape_cast %228 : vector<8xf32> to vector<8x1xf32>
    %230 = vector.broadcast %229 : vector<8x1xf32> to vector<8x16xf32>
    %231 = arith.subf %227, %230 : vector<8x16xf32>
    %232 = math.exp %231 : vector<8x16xf32>
    %cst_87 = arith.constant dense<0.000000e+00> : vector<8xf32>
    %233 = vector.multi_reduction <add>, %232, %cst_87 [1] : vector<8x16xf32> to vector<8xf32>
    %234 = vector.shape_cast %233 : vector<8xf32> to vector<8x1xf32>
    %235 = tpu.reciprocal %234 {approx = true} : vector<8x1xf32> -> vector<8x1xf32>
    %236 = vector.broadcast %235 : vector<8x1xf32> to vector<8x16xf32>
    %237 = arith.mulf %232, %236 : vector<8x16xf32>
    %238 = arith.truncf %237 : vector<8x16xf32> to vector<8x16xbf16>
    %cst_88 = arith.constant dense<0.000000e+00> : vector<8x8xf32>
    %239 = tpu.matmul %238, %224, %cst_88 {dimension_numbers = #tpu.dot_dimension_numbers<[1], [0], [0], [1], [0, 0, 1, 1], [], []>} : vector<8x16xbf16>, vector<16x8xbf16>, vector<8x8xf32> -> vector<8x8xf32>
    %c0_89 = arith.constant 0 : index
    %c24_90 = arith.constant 24 : index
    %240 = vector.load %arg25[%c0_89, %c24_90] : memref<8x32xf32, #tpu.memory_space<vmem>>, vector<8x8xf32>
    tpu.vector_store %arg25[%c0_89, %c24_90], %239 {strides = array<i32>} : memref<8x32xf32, #tpu.memory_space<vmem>>, vector<8x8xf32>,
    %c0_91 = arith.constant 0 : index
    %c0_92 = arith.constant 0 : index
    %241 = vector.load %arg25[%c0_91, %c0_92] : memref<8x32xf32, #tpu.memory_space<vmem>>, vector<8x32xf32>
    %242 = arith.truncf %241 : vector<8x32xf32> to vector<8x32xbf16>
    %c0_93 = arith.constant 0 : index
    %c0_94 = arith.constant 0 : index
    %243 = vector.load %arg12[%c0_93, %c0_94] : memref<32x32xbf16, #tpu.memory_space<vmem>>, vector<32x32xbf16>
    %cst_95 = arith.constant dense<0.000000e+00> : vector<8x32xf32>
    %244 = tpu.matmul %242, %243, %cst_95 {dimension_numbers = #tpu.dot_dimension_numbers<[1], [0], [0], [1], [0, 0, 1, 1], [], []>} : vector<8x32xbf16>, vector<32x32xbf16>, vector<8x32xf32> -> vector<8x32xf32>
    %c0_96 = arith.constant 0 : index
    %c0_97 = arith.constant 0 : index
    %245 = vector.load %arg13[%c0_96, %c0_97] : memref<1x32xf32, #tpu.memory_space<vmem>>, vector<1x32xf32>
    %246 = vector.broadcast %245 : vector<1x32xf32> to vector<8x32xf32>
    %247 = arith.addf %244, %246 : vector<8x32xf32>
    %248 = arith.addf %138, %247 : vector<8x32xf32>
    %c0_98 = arith.constant 0 : index
    %c0_99 = arith.constant 0 : index
    %249 = vector.load %arg16[%c0_98, %c0_99] : memref<1x32xf32, #tpu.memory_space<vmem>>, vector<1x32xf32>
    %c0_100 = arith.constant 0 : index
    %c0_101 = arith.constant 0 : index
    %250 = vector.load %arg17[%c0_100, %c0_101] : memref<1x32xf32, #tpu.memory_space<vmem>>, vector<1x32xf32>
    %cst_102 = arith.constant dense<0.000000e+00> : vector<8xf32>
    %251 = vector.multi_reduction <add>, %248, %cst_102 [1] : vector<8x32xf32> to vector<8xf32>
    %252 = vector.shape_cast %251 : vector<8xf32> to vector<8x1xf32>
    %cst_103 = arith.constant 3.200000e+01 : f32
    %253 = vector.broadcast %cst_103 : f32 to vector<8x1xf32>
    %254 = arith.divf %252, %253 : vector<8x1xf32>
    %255 = vector.broadcast %254 : vector<8x1xf32> to vector<8x32xf32>
    %256 = arith.subf %248, %255 : vector<8x32xf32>
    %257 = arith.mulf %256, %256 : vector<8x32xf32>
    %cst_104 = arith.constant dense<0.000000e+00> : vector<8xf32>
    %258 = vector.multi_reduction <add>, %257, %cst_104 [1] : vector<8x32xf32> to vector<8xf32>
    %259 = vector.shape_cast %258 : vector<8xf32> to vector<8x1xf32>
    %cst_105 = arith.constant 3.200000e+01 : f32
    %260 = vector.broadcast %cst_105 : f32 to vector<8x1xf32>
    %261 = arith.divf %259, %260 : vector<8x1xf32>
    %262 = vector.broadcast %254 : vector<8x1xf32> to vector<8x32xf32>
    %263 = arith.subf %248, %262 : vector<8x32xf32>
    %cst_106 = arith.constant 9.99999974E-6 : f32
    %264 = vector.broadcast %cst_106 : f32 to vector<8x1xf32>
    %265 = arith.addf %261, %264 : vector<8x1xf32>
    %266 = math.rsqrt %265 : vector<8x1xf32>
    %267 = vector.broadcast %266 : vector<8x1xf32> to vector<8x32xf32>
    %268 = arith.mulf %263, %267 : vector<8x32xf32>
    %269 = vector.broadcast %249 : vector<1x32xf32> to vector<8x32xf32>
    %270 = arith.mulf %268, %269 : vector<8x32xf32>
    %271 = vector.broadcast %250 : vector<1x32xf32> to vector<8x32xf32>
    %272 = arith.addf %270, %271 : vector<8x32xf32>
    %273 = arith.truncf %272 : vector<8x32xf32> to vector<8x32xbf16>
    %c0_107 = arith.constant 0 : index
    %c0_108 = arith.constant 0 : index
    %274 = vector.load %arg20[%c0_107, %c0_108] : memref<32x64xbf16, #tpu.memory_space<vmem>>, vector<32x64xbf16>
    %cst_109 = arith.constant dense<0.000000e+00> : vector<8x64xf32>
    %275 = tpu.matmul %273, %274, %cst_109 {dimension_numbers = #tpu.dot_dimension_numbers<[1], [0], [0], [1], [0, 0, 1, 1], [], []>} : vector<8x32xbf16>, vector<32x64xbf16>, vector<8x64xf32> -> vector<8x64xf32>
    %c0_110 = arith.constant 0 : index
    %c0_111 = arith.constant 0 : index
    %276 = vector.load %arg21[%c0_110, %c0_111] : memref<1x64xf32, #tpu.memory_space<vmem>>, vector<1x64xf32>
    %277 = vector.broadcast %276 : vector<1x64xf32> to vector<8x64xf32>
    %278 = arith.addf %275, %277 : vector<8x64xf32>
    %cst_112 = arith.constant 0.000000e+00 : f32
    %279 = vector.broadcast %cst_112 : f32 to vector<8x64xf32>
    %280 = arith.maximumf %278, %279 : vector<8x64xf32>
    %281 = arith.truncf %280 : vector<8x64xf32> to vector<8x64xbf16>
    %c0_113 = arith.constant 0 : index
    %c0_114 = arith.constant 0 : index
    %282 = vector.load %arg22[%c0_113, %c0_114] : memref<64x32xbf16, #tpu.memory_space<vmem>>, vector<64x32xbf16>
    %cst_115 = arith.constant dense<0.000000e+00> : vector<8x32xf32>
    %283 = tpu.matmul %281, %282, %cst_115 {dimension_numbers = #tpu.dot_dimension_numbers<[1], [0], [0], [1], [0, 0, 1, 1], [], []>} : vector<8x64xbf16>, vector<64x32xbf16>, vector<8x32xf32> -> vector<8x32xf32>
    %c0_116 = arith.constant 0 : index
    %c0_117 = arith.constant 0 : index
    %284 = vector.load %arg23[%c0_116, %c0_117] : memref<1x32xf32, #tpu.memory_space<vmem>>, vector<1x32xf32>
    %285 = vector.broadcast %284 : vector<1x32xf32> to vector<8x32xf32>
    %286 = arith.addf %283, %285 : vector<8x32xf32>
    %287 = arith.addf %272, %286 : vector<8x32xf32>
    %c0_118 = arith.constant 0 : index
    %c0_119 = arith.constant 0 : index
    %288 = vector.load %arg18[%c0_118, %c0_119] : memref<1x32xf32, #tpu.memory_space<vmem>>, vector<1x32xf32>
    %c0_120 = arith.constant 0 : index
    %c0_121 = arith.constant 0 : index
    %289 = vector.load %arg19[%c0_120, %c0_121] : memref<1x32xf32, #tpu.memory_space<vmem>>, vector<1x32xf32>
    %cst_122 = arith.constant dense<0.000000e+00> : vector<8xf32>
    %290 = vector.multi_reduction <add>, %287, %cst_122 [1] : vector<8x32xf32> to vector<8xf32>
    %291 = vector.shape_cast %290 : vector<8xf32> to vector<8x1xf32>
    %cst_123 = arith.constant 3.200000e+01 : f32
    %292 = vector.broadcast %cst_123 : f32 to vector<8x1xf32>
    %293 = arith.divf %291, %292 : vector<8x1xf32>
    %294 = vector.broadcast %293 : vector<8x1xf32> to vector<8x32xf32>
    %295 = arith.subf %287, %294 : vector<8x32xf32>
    %296 = arith.mulf %295, %295 : vector<8x32xf32>
    %cst_124 = arith.constant dense<0.000000e+00> : vector<8xf32>
    %297 = vector.multi_reduction <add>, %296, %cst_124 [1] : vector<8x32xf32> to vector<8xf32>
    %298 = vector.shape_cast %297 : vector<8xf32> to vector<8x1xf32>
    %cst_125 = arith.constant 3.200000e+01 : f32
    %299 = vector.broadcast %cst_125 : f32 to vector<8x1xf32>
    %300 = arith.divf %298, %299 : vector<8x1xf32>
    %301 = vector.broadcast %293 : vector<8x1xf32> to vector<8x32xf32>
    %302 = arith.subf %287, %301 : vector<8x32xf32>
    %cst_126 = arith.constant 9.99999974E-6 : f32
    %303 = vector.broadcast %cst_126 : f32 to vector<8x1xf32>
    %304 = arith.addf %300, %303 : vector<8x1xf32>
    %305 = math.rsqrt %304 : vector<8x1xf32>
    %306 = vector.broadcast %305 : vector<8x1xf32> to vector<8x32xf32>
    %307 = arith.mulf %302, %306 : vector<8x32xf32>
    %308 = vector.broadcast %288 : vector<1x32xf32> to vector<8x32xf32>
    %309 = arith.mulf %307, %308 : vector<8x32xf32>
    %310 = vector.broadcast %289 : vector<1x32xf32> to vector<8x32xf32>
    %311 = arith.addf %309, %310 : vector<8x32xf32>
    %c0_127 = arith.constant 0 : index
    %c0_128 = arith.constant 0 : index
    %c0_129 = arith.constant 0 : index
    %312 = vector.load %arg24[%c0_127, %c0_128, %c0_129] : memref<1x8x32xf32, #tpu.memory_space<vmem>>, vector<1x8x32xf32>
    %313 = vector.shape_cast %312 : vector<1x8x32xf32> to vector<8x32xf32>
    %314 = vector.shape_cast %311 : vector<8x32xf32> to vector<1x8x32xf32>
    tpu.vector_store %arg24[%c0_127, %c0_128, %c0_129], %314 {strides = array<i32>} : memref<1x8x32xf32, #tpu.memory_space<vmem>>, vector<1x8x32xf32>,
    return
  }
  func.func @transform_0(%arg0: i32) -> (i32, i32, i32) {
    %c0_i32 = arith.constant 0 : i32
    %c0_i32_0 = arith.constant 0 : i32
    %c0_i32_1 = arith.constant 0 : i32
    return %arg0, %c0_i32, %c0_i32_0 : i32, i32, i32
  }
  func.func @transform_1(%arg0: i32) -> (i32, i32, i32) {
    %c0_i32 = arith.constant 0 : i32
    %c0_i32_0 = arith.constant 0 : i32
    %c0_i32_1 = arith.constant 0 : i32
    return %arg0, %c0_i32, %c0_i32_0 : i32, i32, i32
  }
  func.func @transform_2(%arg0: i32) -> (i32, i32, i32) {
    %c0_i32 = arith.constant 0 : i32
    %c0_i32_0 = arith.constant 0 : i32
    %c0_i32_1 = arith.constant 0 : i32
    return %arg0, %c0_i32, %c0_i32_0 : i32, i32, i32
  }
  func.func @transform_3(%arg0: i32) -> (i32, i32) {
    %c0_i32 = arith.constant 0 : i32
    %c0_i32_0 = arith.constant 0 : i32
    %c0_i32_1 = arith.constant 0 : i32
    return %c0_i32, %c0_i32_0 : i32, i32
  }
  func.func @transform_4(%arg0: i32) -> (i32, i32) {
    %c0_i32 = arith.constant 0 : i32
    %c0_i32_0 = arith.constant 0 : i32
    %c0_i32_1 = arith.constant 0 : i32
    return %c0_i32, %c0_i32_0 : i32, i32
  }
  func.func @transform_5(%arg0: i32) -> (i32, i32) {
    %c0_i32 = arith.constant 0 : i32
    %c0_i32_0 = arith.constant 0 : i32
    %c0_i32_1 = arith.constant 0 : i32
    return %c0_i32, %c0_i32_0 : i32, i32
  }
  func.func @transform_6(%arg0: i32) -> (i32, i32) {
    %c0_i32 = arith.constant 0 : i32
    %c0_i32_0 = arith.constant 0 : i32
    %c0_i32_1 = arith.constant 0 : i32
    return %c0_i32, %c0_i32_0 : i32, i32
  }
  func.func @transform_7(%arg0: i32) -> (i32, i32) {
    %c0_i32 = arith.constant 0 : i32
    %c0_i32_0 = arith.constant 0 : i32
    %c0_i32_1 = arith.constant 0 : i32
    return %c0_i32, %c0_i32_0 : i32, i32
  }
  func.func @transform_8(%arg0: i32) -> (i32, i32) {
    %c0_i32 = arith.constant 0 : i32
    %c0_i32_0 = arith.constant 0 : i32
    %c0_i32_1 = arith.constant 0 : i32
    return %c0_i32, %c0_i32_0 : i32, i32
  }
  func.func @transform_9(%arg0: i32) -> (i32, i32) {
    %c0_i32 = arith.constant 0 : i32
    %c0_i32_0 = arith.constant 0 : i32
    %c0_i32_1 = arith.constant 0 : i32
    return %c0_i32, %c0_i32_0 : i32, i32
  }
  func.func @transform_10(%arg0: i32) -> (i32, i32) {
    %c0_i32 = arith.constant 0 : i32
    %c0_i32_0 = arith.constant 0 : i32
    %c0_i32_1 = arith.constant 0 : i32
    return %c0_i32, %c0_i32_0 : i32, i32
  }
  func.func @transform_11(%arg0: i32) -> (i32, i32) {
    %c0_i32 = arith.constant 0 : i32
    %c0_i32_0 = arith.constant 0 : i32
    %c0_i32_1 = arith.constant 0 : i32
    return %c0_i32, %c0_i32_0 : i32, i32
  }
  func.func @transform_12(%arg0: i32) -> (i32, i32) {
    %c0_i32 = arith.constant 0 : i32
    %c0_i32_0 = arith.constant 0 : i32
    %c0_i32_1 = arith.constant 0 : i32
    return %c0_i32, %c0_i32_0 : i32, i32
  }
  func.func @transform_13(%arg0: i32) -> (i32, i32) {
    %c0_i32 = arith.constant 0 : i32
    %c0_i32_0 = arith.constant 0 : i32
    %c0_i32_1 = arith.constant 0 : i32
    return %c0_i32, %c0_i32_0 : i32, i32
  }
  func.func @transform_14(%arg0: i32) -> (i32, i32) {
    %c0_i32 = arith.constant 0 : i32
    %c0_i32_0 = arith.constant 0 : i32
    %c0_i32_1 = arith.constant 0 : i32
    return %c0_i32, %c0_i32_0 : i32, i32
  }
  func.func @transform_15(%arg0: i32) -> (i32, i32) {
    %c0_i32 = arith.constant 0 : i32
    %c0_i32_0 = arith.constant 0 : i32
    %c0_i32_1 = arith.constant 0 : i32
    return %c0_i32, %c0_i32_0 : i32, i32
  }
  func.func @transform_16(%arg0: i32) -> (i32, i32) {
    %c0_i32 = arith.constant 0 : i32
    %c0_i32_0 = arith.constant 0 : i32
    %c0_i32_1 = arith.constant 0 : i32
    return %c0_i32, %c0_i32_0 : i32, i32
  }
  func.func @transform_17(%arg0: i32) -> (i32, i32) {
    %c0_i32 = arith.constant 0 : i32
    %c0_i32_0 = arith.constant 0 : i32
    %c0_i32_1 = arith.constant 0 : i32
    return %c0_i32, %c0_i32_0 : i32, i32
  }
  func.func @transform_18(%arg0: i32) -> (i32, i32) {
    %c0_i32 = arith.constant 0 : i32
    %c0_i32_0 = arith.constant 0 : i32
    %c0_i32_1 = arith.constant 0 : i32
    return %c0_i32, %c0_i32_0 : i32, i32
  }
  func.func @transform_19(%arg0: i32) -> (i32, i32) {
    %c0_i32 = arith.constant 0 : i32
    %c0_i32_0 = arith.constant 0 : i32
    %c0_i32_1 = arith.constant 0 : i32
    return %c0_i32, %c0_i32_0 : i32, i32
  }
  func.func @transform_20(%arg0: i32) -> (i32, i32) {
    %c0_i32 = arith.constant 0 : i32
    %c0_i32_0 = arith.constant 0 : i32
    %c0_i32_1 = arith.constant 0 : i32
    return %c0_i32, %c0_i32_0 : i32, i32
  }
  func.func @transform_21(%arg0: i32) -> (i32, i32) {
    %c0_i32 = arith.constant 0 : i32
    %c0_i32_0 = arith.constant 0 : i32
    %c0_i32_1 = arith.constant 0 : i32
    return %c0_i32, %c0_i32_0 : i32, i32
  }
  func.func @transform_22(%arg0: i32) -> (i32, i32) {
    %c0_i32 = arith.constant 0 : i32
    %c0_i32_0 = arith.constant 0 : i32
    %c0_i32_1 = arith.constant 0 : i32
    return %c0_i32, %c0_i32_0 : i32, i32
  }
  func.func @transform_23(%arg0: i32) -> (i32, i32, i32) {
    %c0_i32 = arith.constant 0 : i32
    %c0_i32_0 = arith.constant 0 : i32
    %c0_i32_1 = arith.constant 0 : i32
    return %arg0, %c0_i32, %c0_i32_0 : i32, i32, i32
  }
}

</mosaic_0001>

<bundles_post_ra>
// kernel: tpu_custom_call.1
= control target key start
LH: loop header
LB: loop body
LE: loop exit
PB: predicated region body
PF: predicated region fallthrough
CT: control target
= control target key end

     0   :  { %s4270_s0 = inlined_call_operand.vmem [shape: f32[2,8,32], index: 0, kind: input, shape index: {}]   ;;  %s4271_s1 = inlined_call_operand.vmem [shape: f32[2,16,32], index: 1, kind: input, shape index: {}]   ;;  %s4272_s2 = inlined_call_operand.hbm [shape: f32[2,8,8], index: 2, kind: input, shape index: {}]   ;;  %s4273_s3 = inlined_call_operand.hbm [shape: bf16[32,96], index: 3, kind: input, shape index: {}]   ;;  %s4274_s4 = inlined_call_operand.vmem [shape: f32[1,96], index: 4, kind: input, shape index: {}]   ;;  %s4275_s5 = inlined_call_operand.hbm [shape: bf16[32,32], index: 5, kind: input, shape index: {}]   ;;  %s4276_s6 = inlined_call_operand.hbm [shape: f32[1,32], index: 6, kind: input, shape index: {}]   ;;  %s4277_s7 = inlined_call_operand.hbm [shape: bf16[32,32], index: 7, kind: input, shape index: {}]   ;;  %s4278_s8 = inlined_call_operand.hbm [shape: f32[1,32], index: 8, kind: input, shape index: {}]   ;;  %s4279_s9 = inlined_call_operand.vmem [shape: bf16[32,64], index: 9, kind: input, shape index: {}]   ;;  %s4280_s10 = inlined_call_operand.hbm [shape: f32[1,64], index: 10, kind: input, shape index: {}]   ;;  %s4281_s11 = inlined_call_operand.hbm [shape: bf16[32,32], index: 11, kind: input, shape index: {}]   ;;  %s4282_s12 = inlined_call_operand.hbm [shape: f32[1,32], index: 12, kind: input, shape index: {}]   ;;  %s4283_s13 = inlined_call_operand.hbm [shape: f32[1,32], index: 13, kind: input, shape index: {}]   ;;  %s4284_s14 = inlined_call_operand.vmem [shape: f32[1,32], index: 14, kind: input, shape index: {}]   ;;  %s4285_s15 = inlined_call_operand.vmem [shape: f32[1,32], index: 15, kind: input, shape index: {}]   ;;  %s4286_s16 = inlined_call_operand.vmem [shape: f32[1,32], index: 16, kind: input, shape index: {}]   ;;  %s4287_s17 = inlined_call_operand.vmem [shape: f32[1,32], index: 17, kind: input, shape index: {}]   ;;  %s4288_s18 = inlined_call_operand.vmem [shape: f32[1,32], index: 18, kind: input, shape index: {}]   ;;  %s4289_s19 = inlined_call_operand.vmem [shape: bf16[32,64], index: 19, kind: input, shape index: {}]   ;;  %s4290_s20 = inlined_call_operand.vmem [shape: f32[1,64], index: 20, kind: input, shape index: {}]   ;;  %s4291_s21 = inlined_call_operand.vmem [shape: bf16[64,32], index: 21, kind: input, shape index: {}]   ;;  %s4292_s22 = inlined_call_operand.vmem [shape: f32[1,32], index: 22, kind: input, shape index: {}]   ;;  %s4293_s23 = inlined_call_operand.hbm [shape: f32[2,8,32], index: 23, kind: output, shape index: {}]  }
   0x1   :  { %4317 = sst [smem:[#allocation28_spill]] %s4270_s0 }
   0x2   :  { %4318 = sst [smem:[#allocation29_spill]] %s4271_s1 }
   0x3   :  { %4319 = sst [smem:[#allocation30_spill]] %s4272_s2 }
   0x4   :  { %4320 = sst [smem:[#allocation31_spill]] %s4273_s3 }
   0x5   :  { %4321 = sst [smem:[#allocation32_spill]] %s4274_s4 }
   0x6   :  { %4322 = sst [smem:[#allocation33_spill]] %s4275_s5 }
   0x7   :  { %4323 = sst [smem:[#allocation34_spill]] %s4276_s6 }
   0x8   :  { %4324 = sst [smem:[#allocation35_spill]] %s4277_s7 }
   0x9   :  { %4325 = sst [smem:[#allocation36_spill]] %s4278_s8 }
   0xa   :  { %4326 = sst [smem:[#allocation37_spill]] %s4279_s9 }
   0xb   :  { %4327 = sst [smem:[#allocation38_spill]] %s4280_s10 }
   0xc   :  { %4328 = sst [smem:[#allocation39_spill]] %s4281_s11 }
   0xd   :  { %4329 = sst [smem:[#allocation40_spill]] %s4282_s12 }
   0xe   :  { %4330 = sst [smem:[#allocation41_spill]] %s4285_s15 }
   0xf   :  { %4331 = sst [smem:[#allocation42_spill]] %s4286_s16 }
  0x10   :  { %4332 = sst [smem:[#allocation43_spill]] %s4287_s17 }
  0x11   :  { %4333 = sst [smem:[#allocation44_spill]] %s4288_s18 }
  0x12   :  { %4334 = sst [smem:[#allocation45_spill]] %s4289_s19 }
  0x13   :  { %4335 = sst [smem:[#allocation46_spill]] %s4290_s20 }
  0x14   :  { %4336 = sst [smem:[#allocation47_spill]] %s4291_s21 }
  0x15   :  { %4337 = sst [smem:[#allocation48_spill]] %s4292_s22 }
  0x16   :  { %4338 = sst [smem:[#allocation49_spill]] %s4293_s23 }
  0x17   :  { %28 = vsyncpa [#allocation4], 0 }
  0x18   :  { %30 = vsyncpa [#allocation4 + $0x1], 0 }
  0x19   :  { %31 = vsyncpa [#allocation7], 0 }
  0x1a   :  { %32 = vsyncpa [#allocation10], 0 }
  0x1b   :  { %33 = vsyncpa [#allocation13], 0 }
  0x1c   :  { %34 = vsyncpa [#allocation16], 0 }
  0x1d   :  { %35 = vsyncpa [#allocation19], 0 }
  0x1e   :  { %36 = vsyncpa [#allocation5], 0 }
  0x1f   :  { %38 = vsyncpa [#allocation5 + $0x1], 0  ;;  %s3613_s4 = smov 0   ;;  %s3615_s30 = smov 0  }
  0x20   :  { %s3617_s24 = smov 0   ;;  %s3619_s25 = smov 0  }
  0x21 LB: > { %s3464_s5 = smov [#allocation6]   ;;  %s3634_s26 = sadd.s32 4294967295, %s3462_s25   ;;  %s3462_s25 = sphi %s3619_s25, %s4395_s25   ;;  %s3458_s24 = sphi %s3617_s24, %s4394_s24   ;;  %s3454_s30 = sphi %s3615_s30, %s4393_s30   ;;  %s3450_s4 = sphi %s3613_s4, %s4392_s4  }
  0x22   : > { %s585_s1 = sshll.u32 %s3464_s5, 4  ;;  %p2589_p0 = scmp.ge.s32.totalorder %s3462_s25, 1  ;;  %s3639_s1 = int_to_ptr.vmem [resolvable:$true] %s585_s1 }
  0x23   : > { %p4304_p1 = scmp.eq.s32.totalorder %s3634_s26, 0  ;;  %p573_p2 = scmp.lt.s32.totalorder %s3462_s25, 3 }
  0x24   : > { %s3465_s6 = smov [#allocation9]   ;;  %s3466_s28 = smov [#allocation12]  }
  0x25   : > { %p3641_p3 = pnand %p2589_p0, %p573_p2  ;;  %s615_s27 = sshll.u32 %s3465_s6, 4  ;;  %s3654_s27 = int_to_ptr.vmem [resolvable:$true] %s615_s27 }
  0x26   : > { %s639_s29 = sshll.u32 %s3466_s28, 4  ;;  %s4341_s5 = sld [smem:[#allocation31_spill]]  ;;  %s3656_s29 = int_to_ptr.vmem [resolvable:$true] %s639_s29 }
  0x27   : > { %s4339_s2 = scalar_select %p3641_p3, 1, 0 }
  0x28   : > { %p2925_p5 = pneg %p3641_p3 }
  0x2a   : > { %p3650_p6 = pnand %p2925_p5, %p4304_p1 }
  0x2c   : > { %s3094_s23 = scalar_lea.hbm %s4341_s5, 256  ;;  %p3666_p8 = pneg %p3650_p6 }
  0x2d   : > { %p3095_p7 = scmp.ne.s32.totalorder %s4341_s5, %s3094_s23  ;;  %p3101_p11 = scmp.lt.u32.totalorder %s3094_s23, %s4341_s5 }
  0x2f   : > { %p3097_p9 = pnand %p3666_p8, %p3095_p7 }
  0x31   : > { %p3098_p10 = pneg %p3097_p9 }
  0x33   : > { %p3103_p12 = pnand %p3101_p11, %p3098_p10 }
  0x35   : > { %3106 = shalt.err (!%p3103_p12)
}
  0x36   : > { %s3107_s17 = scalar_lea.vmem %s3639_s1, 256  ;;  %p3115_p5 = scmp.lt.s32.totalorder %s3639_s1, %s3639_s1 }
  0x37   : > { %p3108_p13 = scmp.ne.s32.totalorder %s3639_s1, %s3107_s17  ;;  %p3116_p4 = scmp.lt.s32.totalorder %s3107_s17, %s3107_s17 }
  0x39   : > { %p3110_p0 = pnand %p3108_p13, %p3666_p8  ;;  %p3117_p7 = por %p3116_p4, %p3115_p5 }
  0x3b   : > { %p3111_p2 = pneg %p3110_p0 }
  0x3d   : > { %p3118_p9 = pnand %p3117_p7, %p3111_p2 }
  0x3f   : > { %3121 = shalt.err (!%p3118_p9)
}
  0x40   : > { %s4302_s18 = smov 64   ;;  %s3468_s22 = smov 4  }
  0x41   : > { %2928 = dma.hbm_to_vmem [thread:$0]  (!%p3650_p6), %s4341_s5, 256, %s3639_s1, [#allocation7], %s4302_s18, %s4302_s18, %s3468_s22  }
  0x42   : > { %s4343_s20 = sld [smem:[#allocation34_spill]] }
  0x48   : > { %s3122_s17 = scalar_lea.hbm %s4343_s20, 16 }
  0x49   : > { %p3123_p4 = scmp.ne.s32.totalorder %s4343_s20, %s3122_s17  ;;  %p3129_p12 = scmp.lt.u32.totalorder %s3122_s17, %s4343_s20 }
  0x4b   : > { %p3125_p10 = pnand %p3123_p4, %p3666_p8 }
  0x4d   : > { %p3126_p11 = pneg %p3125_p10 }
  0x4f   : > { %p3131_p13 = pnand %p3129_p12, %p3126_p11 }
  0x51   : > { %3134 = shalt.err (!%p3131_p13)
}
  0x52   : > { %s3135_s1 = scalar_lea.vmem %s3654_s27, 16  ;;  %s3142_s15 = scalar_lea.vmem %s3654_s27, 32 }
  0x53   : > { %p3136_p0 = scmp.ne.s32.totalorder %s3654_s27, %s3135_s1  ;;  %p3143_p7 = scmp.lt.s32.totalorder %s3654_s27, %s3654_s27 }
  0x54   : > { %p3144_p9 = scmp.lt.s32.totalorder %s3142_s15, %s3135_s1 }
  0x55   : > { %p3138_p2 = pnand %p3136_p0, %p3666_p8 }
  0x56   : > { %p3145_p4 = por %p3144_p9, %p3143_p7 }
  0x57   : > { %p3139_p5 = pneg %p3138_p2 }
  0x59   : > { %p3146_p10 = pnand %p3145_p4, %p3139_p5 }
  0x5b   : > { %3149 = shalt.err (!%p3146_p10)
}
  0x5c   : > { %2934 = dma.hbm_to_vmem [thread:$0]  (!%p3650_p6), %s4343_s20, 16, %s3654_s27, [#allocation10]  }
  0x5d   : > { %s4344_s8 = sld [smem:[#allocation36_spill]] }
  0x63   : > { %s3150_s3 = scalar_lea.hbm %s4344_s8, 16 }
  0x64   : > { %p3151_p11 = scmp.ne.s32.totalorder %s4344_s8, %s3150_s3  ;;  %p3157_p0 = scmp.lt.u32.totalorder %s3150_s3, %s4344_s8 }
  0x66   : > { %p3153_p12 = pnand %p3151_p11, %p3666_p8 }
  0x68   : > { %p3154_p13 = pneg %p3153_p12 }
  0x6a   : > { %p3159_p2 = pnand %p3157_p0, %p3154_p13 }
  0x6c   : > { %3162 = shalt.err (!%p3159_p2)
}
  0x6d   : > { %s3163_s27 = scalar_lea.vmem %s3656_s29, 16  ;;  %s3170_s15 = scalar_lea.vmem %s3656_s29, 32 }
  0x6e   : > { %p3164_p5 = scmp.ne.s32.totalorder %s3656_s29, %s3163_s27  ;;  %p3171_p4 = scmp.lt.s32.totalorder %s3656_s29, %s3656_s29 }
  0x6f   : > { %p3172_p10 = scmp.lt.s32.totalorder %s3170_s15, %s3163_s27 }
  0x70   : > { %p3166_p7 = pnand %p3164_p5, %p3666_p8 }
  0x71   : > { %p3173_p11 = por %p3172_p10, %p3171_p4 }
  0x72   : > { %p3167_p9 = pneg %p3166_p7 }
  0x74   : > { %p3174_p12 = pnand %p3173_p11, %p3167_p9 }
  0x76   : > { %3177 = shalt.err (!%p3174_p12)
}
  0x77   : > { %2940 = dma.hbm_to_vmem [thread:$0]  (!%p3650_p6), %s4344_s8, 16, %s3656_s29, [#allocation13]  }
  0x78   : > { %s3469_s21 = smov [#allocation15]   ;;  %s3470_s3 = smov [#allocation8]  }
  0x79   : > { %s663_s23 = sshll.u32 %s3469_s21, 4  ;;  %s601_s0 = sshll.u32 %s3470_s3, 4  ;;  %s664_s23 = int_to_ptr.vmem [resolvable:$true] %s663_s23  ;;  %s602_s0 = int_to_ptr.vmem [resolvable:$true] %s601_s0 }
  0x7a   : > { %s4345_s11 = sld [smem:[#allocation39_spill]] }
  0x80   : > { %s3178_s1 = scalar_lea.hbm %s4345_s11, 256 }
  0x81   : > { %p3179_p13 = scmp.ne.s32.totalorder %s4345_s11, %s3178_s1  ;;  %p3185_p5 = scmp.lt.u32.totalorder %s3178_s1, %s4345_s11 }
  0x83   : > { %p3181_p0 = pnand %p3179_p13, %p3666_p8 }
  0x85   : > { %p3182_p2 = pneg %p3181_p0 }
  0x87   : > { %p3187_p7 = pnand %p3185_p5, %p3182_p2 }
  0x89   : > { %3190 = shalt.err (!%p3187_p7)
}
  0x8a   : > { %s3191_s29 = scalar_lea.vmem %s664_s23, 256  ;;  %p3199_p11 = scmp.lt.s32.totalorder %s664_s23, %s664_s23 }
  0x8b   : > { %p3192_p9 = scmp.ne.s32.totalorder %s664_s23, %s3191_s29  ;;  %p3200_p12 = scmp.lt.s32.totalorder %s3191_s29, %s3191_s29 }
  0x8d   : > { %p3194_p4 = pnand %p3192_p9, %p3666_p8  ;;  %p3201_p1 = por %p3200_p12, %p3199_p11 }
  0x8f   : > { %p3195_p10 = pneg %p3194_p4 }
  0x91   : > { %p3202_p3 = pnand %p3201_p1, %p3195_p10 }
  0x93   : > { %3205 = shalt.err (!%p3202_p3)
}
  0x94   : > { %s4346_s19 = smov 64   ;;  %s4347_s17 = sld [smem:[#allocation33_spill]] }
  0x95   : > { %2946 = dma.hbm_to_vmem [thread:$0]  (!%p3650_p6), %s4345_s11, 256, %s664_s23, [#allocation16], %s4346_s19, %s4346_s19, %s3468_s22  }
  0x9a   : > { %s3206_s1 = scalar_lea.hbm %s4347_s17, 256 }
  0x9b   : > { %p3207_p1 = scmp.ne.s32.totalorder %s4347_s17, %s3206_s1  ;;  %p3213_p0 = scmp.lt.u32.totalorder %s3206_s1, %s4347_s17 }
  0x9d   : > { %p3209_p3 = pnand %p3207_p1, %p3666_p8 }
  0x9f   : > { %p3210_p13 = pneg %p3209_p3 }
  0xa1   : > { %p3215_p2 = pnand %p3213_p0, %p3210_p13 }
  0xa3   : > { %3218 = shalt.err (!%p3215_p2)
}
  0xa4   : > { %s3219_s18 = scalar_lea.vmem %s602_s0, 256  ;;  %p3227_p4 = scmp.lt.s32.totalorder %s602_s0, %s602_s0 }
  0xa5   : > { %p3220_p5 = scmp.ne.s32.totalorder %s602_s0, %s3219_s18  ;;  %p3228_p10 = scmp.lt.s32.totalorder %s3219_s18, %s3219_s18 }
  0xa7   : > { %p3222_p7 = pnand %p3220_p5, %p3666_p8  ;;  %p3229_p11 = por %p3228_p10, %p3227_p4 }
  0xa9   : > { %p3223_p9 = pneg %p3222_p7 }
  0xab   : > { %p3230_p12 = pnand %p3229_p11, %p3223_p9 }
  0xad   : > { %3233 = shalt.err (!%p3230_p12)
}
  0xae   : > { %2931 = dma.hbm_to_vmem [thread:$0]  (!%p3650_p6), %s4347_s17, 256, %s602_s0, [#allocation7], %s4346_s19, %s4346_s19, %s3468_s22  }
  0xaf   : > { %s3471_s3 = smov [#allocation11]   ;;  %s3472_s1 = smov [#allocation14]  }
  0xb0   : > { %s625_s28 = sshll.u32 %s3471_s3, 4  ;;  %s653_s27 = sshll.u32 %s3472_s1, 4  ;;  %s626_s28 = int_to_ptr.vmem [resolvable:$true] %s625_s28  ;;  %s654_s27 = int_to_ptr.vmem [resolvable:$true] %s653_s27 }
  0xb1   : > { %s4348_s29 = sld [smem:[#allocation35_spill]] }
  0xb7   : > { %s3234_s18 = scalar_lea.hbm %s4348_s29, 256 }
  0xb8   : > { %p3235_p1 = scmp.ne.s32.totalorder %s4348_s29, %s3234_s18  ;;  %p3241_p0 = scmp.lt.u32.totalorder %s3234_s18, %s4348_s29 }
  0xba   : > { %p3237_p3 = pnand %p3235_p1, %p3666_p8 }
  0xbc   : > { %p3238_p13 = pneg %p3237_p3 }
  0xbe   : > { %p3243_p2 = pnand %p3241_p0, %p3238_p13 }
  0xc0   : > { %3246 = shalt.err (!%p3243_p2)
}
  0xc1   : > { %s3247_s0 = scalar_lea.vmem %s626_s28, 256  ;;  %p3255_p4 = scmp.lt.s32.totalorder %s626_s28, %s626_s28 }
  0xc2   : > { %p3248_p5 = scmp.ne.s32.totalorder %s626_s28, %s3247_s0  ;;  %p3256_p10 = scmp.lt.s32.totalorder %s3247_s0, %s3247_s0 }
  0xc4   : > { %p3250_p7 = pnand %p3248_p5, %p3666_p8  ;;  %p3257_p11 = por %p3256_p10, %p3255_p4 }
  0xc6   : > { %p3251_p9 = pneg %p3250_p7 }
  0xc8   : > { %p3258_p12 = pnand %p3257_p11, %p3251_p9 }
  0xca   : > { %3261 = shalt.err (!%p3258_p12)
}
  0xcb   : > { %2937 = dma.hbm_to_vmem [thread:$0]  (!%p3650_p6), %s4348_s29, 256, %s626_s28, [#allocation10], %s4346_s19, %s4346_s19, %s3468_s22  }
  0xcc   : > { %s4349_s10 = sld [smem:[#allocation38_spill]] }
  0xd2   : > { %s3262_s3 = scalar_lea.hbm %s4349_s10, 16 }
  0xd3   : > { %p3263_p1 = scmp.ne.s32.totalorder %s4349_s10, %s3262_s3  ;;  %p3269_p0 = scmp.lt.u32.totalorder %s3262_s3, %s4349_s10 }
  0xd5   : > { %p3265_p3 = pnand %p3263_p1, %p3666_p8 }
  0xd7   : > { %p3266_p13 = pneg %p3265_p3 }
  0xd9   : > { %p3271_p2 = pnand %p3269_p0, %p3266_p13 }
  0xdb   : > { %3274 = shalt.err (!%p3271_p2)
}
  0xdc   : > { %s3275_s23 = scalar_lea.vmem %s654_s27, 16  ;;  %s3282_s22 = scalar_lea.vmem %s654_s27, 32 }
  0xdd   : > { %p3276_p5 = scmp.ne.s32.totalorder %s654_s27, %s3275_s23  ;;  %p3283_p4 = scmp.lt.s32.totalorder %s654_s27, %s654_s27 }
  0xde   : > { %p3284_p10 = scmp.lt.s32.totalorder %s3282_s22, %s3275_s23 }
  0xdf   : > { %p3278_p7 = pnand %p3276_p5, %p3666_p8 }
  0xe0   : > { %p3285_p11 = por %p3284_p10, %p3283_p4 }
  0xe1   : > { %p3279_p9 = pneg %p3278_p7 }
  0xe3   : > { %p3286_p12 = pnand %p3285_p11, %p3279_p9 }
  0xe5   : > { %3289 = shalt.err (!%p3286_p12)
}
  0xe6   : > { %2943 = dma.hbm_to_vmem [thread:$0]  (!%p3650_p6), %s4349_s10, 16, %s654_s27, [#allocation13]  }
  0xe7   : > { %s3473_s0 = smov [#allocation17]   ;;  %s3474_s11 = smov [#allocation18]  }
  0xe8   : > { %s677_s8 = sshll.u32 %s3473_s0, 4  ;;  %s688_s5 = sshll.u32 %s3474_s11, 4  ;;  %s678_s8 = int_to_ptr.vmem [resolvable:$true] %s677_s8  ;;  %s689_s5 = int_to_ptr.vmem [resolvable:$true] %s688_s5 }
  0xe9   : > { %s4350_s12 = sld [smem:[#allocation40_spill]] }
  0xef   : > { %s3290_s1 = scalar_lea.hbm %s4350_s12, 16 }
  0xf0   : > { %p3291_p1 = scmp.ne.s32.totalorder %s4350_s12, %s3290_s1  ;;  %p3297_p0 = scmp.lt.u32.totalorder %s3290_s1, %s4350_s12 }
  0xf2   : > { %p3293_p3 = pnand %p3291_p1, %p3666_p8 }
  0xf4   : > { %p3294_p13 = pneg %p3293_p3 }
  0xf6   : > { %p3299_p2 = pnand %p3297_p0, %p3294_p13 }
  0xf8   : > { %3302 = shalt.err (!%p3299_p2)
}
  0xf9   : > { %s3303_s27 = scalar_lea.vmem %s678_s8, 16  ;;  %s3310_s22 = scalar_lea.vmem %s678_s8, 32 }
  0xfa   : > { %p3304_p5 = scmp.ne.s32.totalorder %s678_s8, %s3303_s27  ;;  %p3311_p4 = scmp.lt.s32.totalorder %s678_s8, %s678_s8 }
  0xfb   : > { %p3312_p10 = scmp.lt.s32.totalorder %s3310_s22, %s3303_s27 }
  0xfc   : > { %p3306_p7 = pnand %p3304_p5, %p3666_p8 }
  0xfd   : > { %p3313_p11 = por %p3312_p10, %p3311_p4 }
  0xfe   : > { %p3307_p9 = pneg %p3306_p7 }
 0x100   : > { %p3314_p12 = pnand %p3313_p11, %p3307_p9 }
 0x102   : > { %3317 = shalt.err (!%p3314_p12)
}
 0x103   : > { %2949 = dma.hbm_to_vmem [thread:$0]  (!%p3650_p6), %s4350_s12, 16, %s678_s8, [#allocation16]  }
 0x104   : > { %s3318_s21 = scalar_lea.hbm %s4283_s13, 16 }
 0x105   : > { %p3319_p1 = scmp.ne.s32.totalorder %s4283_s13, %s3318_s21  ;;  %p3325_p0 = scmp.lt.u32.totalorder %s3318_s21, %s4283_s13 }
 0x107   : > { %p3321_p3 = pnand %p3319_p1, %p3666_p8 }
 0x109   : > { %p3322_p13 = pneg %p3321_p3 }
 0x10b   : > { %p3327_p2 = pnand %p3325_p0, %p3322_p13 }
 0x10d   : > { %3330 = shalt.err (!%p3327_p2)
}
 0x10e   : > { %s3331_s18 = scalar_lea.vmem %s689_s5, 16  ;;  %s3338_s8 = scalar_lea.vmem %s689_s5, 32 }
 0x10f   : > { %p3332_p5 = scmp.ne.s32.totalorder %s689_s5, %s3331_s18  ;;  %p3339_p4 = scmp.lt.s32.totalorder %s689_s5, %s689_s5 }
 0x110   : > { %p3340_p10 = scmp.lt.s32.totalorder %s3338_s8, %s3331_s18 }
 0x111   : > { %p3334_p7 = pnand %p3332_p5, %p3666_p8 }
 0x112   : > { %p3341_p11 = por %p3340_p10, %p3339_p4 }
 0x113   : > { %p3335_p9 = pneg %p3334_p7 }
 0x115   : > { %p3342_p12 = pnand %p3341_p11, %p3335_p9 }
 0x117   : > { %3345 = shalt.err (!%p3342_p12)
}
 0x118   : > { %2952 = dma.hbm_to_vmem [thread:$0]  (!%p3650_p6), %s4283_s13, 16, %s689_s5, [#allocation19]  }
 0x119   : > { %s2588_s6 = sadd.s32 4294967294, %s3462_s25   ;;  %s3857_s7 = sadd.s32 1, %s3462_s25  }
 0x11a   : > { %s103_s22 = sadd.s32 1, %s3458_s24  ;;  %s100_s19 = ssub.s32 %s3462_s25, %s3857_s7 }
 0x11b   : > { %p110_p8 = scmp.ne.s32.totalorder %s3458_s24, %s3454_s30  ;;  %p101_p1 = scmp.eq.s32.totalorder %s100_s19, 0 }
 0x11c   : > { %p111_p3 = scmp.eq.s32.totalorder %s3462_s25, 0  ;;  %p116_p13 = scmp.ne.s32.totalorder %s3454_s30, %s3450_s4 }
 0x11d   : > { %p560_p0 = scmp.eq.s32.totalorder %s3634_s26, 1  ;;  %p4351_p5 = scmp.eq.s32.totalorder %s3634_s26, 0 }
 0x11e   : > { %s3869_s28 = scalar_select %p101_p1, %s3458_s24, %s103_s22  }
 0x11f   : > { %p112_p2 = por %p111_p3, %p110_p8  ;;  %p3873_p7 = por %p4351_p5, %p116_p13 }
 0x120   : > { %p3877_p6 = por %p560_p0, %p110_p8  ;;  %p566_p9 = scmp.eq.s32.totalorder %s2588_s6, 1 }
 0x121   : > { %p2970_p4 = scmp.lt.s32.totalorder %s3462_s25, 2  ;;  %s741_s11 = sand.u32 1, %s3458_s24  }
 0x122   : > { %s4353_s5 = scalar_select %p3877_p6, 1, 0 }
 0x123   : > { %p3883_p10 = por %p566_p9, %p116_p13  ;;  %s2600_s3 = sshll.u32 %s741_s11, 3 }
 0x124   : > { %s2601_s1 = sshll.u32 %s3462_s25, 7  ;;  %s4355_s18 = sld [smem:[#allocation30_spill]] }
 0x125   : > { %s4354_s21 = scalar_select %p3883_p10, 1, 0 }
 0x126   : > { %s745_s23 = scalar_lea.vmem [#allocation3], %s2600_s3  ;;  %p3893_p11 = pnand %p2970_p4, %p112_p2 }
 0x127   : > { %s752_s27 = sshll.u32 %s745_s23, 4  ;;  %s742_s22 = scalar_lea.sflag [#allocation4], %s741_s11  ;;  %s3897_s27 = int_to_ptr.vmem [resolvable:$true] %s752_s27 }
 0x128   : > { %p3348_p8 = pneg %p3893_p11 }
 0x12a   : > { %s3891_s8 = scalar_lea.hbm %s4355_s18, %s2601_s1  ;;  %s3351_s15 = scalar_lea.hbm %s4355_s18, 256 }
 0x12b   : > { %s3346_s19 = scalar_lea.hbm %s3891_s8, 128  ;;  %p3352_p13 = scmp.lt.u32.totalorder %s3891_s8, %s4355_s18 }
 0x12c   : > { %p3347_p12 = scmp.ne.s32.totalorder %s3891_s8, %s3346_s19  ;;  %p3353_p0 = scmp.lt.u32.totalorder %s3351_s15, %s3346_s19 }
 0x12d   : > { %p3355_p5 = scmp.lt.u32.totalorder %s3346_s19, %s3891_s8 }
 0x12e   : > { %p3349_p1 = pnand %p3348_p8, %p3347_p12  ;;  %p3354_p2 = por %p3353_p0, %p3352_p13 }
 0x130   : > { %p3350_p3 = pneg %p3349_p1  ;;  %p3356_p9 = por %p3355_p5, %p3354_p2 }
 0x132   : > { %p3357_p4 = pnand %p3356_p9, %p3350_p3 }
 0x134   : > { %3360 = shalt.err (!%p3357_p4)
}
 0x135   : > { %s3361_s11 = scalar_lea.vmem %s3897_s27, 128  ;;  %s3475_s1 = smov [#allocation3]  }
 0x136   : > { %p3362_p12 = scmp.ne.s32.totalorder %s3897_s27, %s3361_s11  ;;  %s3366_s3 = sshll.u32 %s3475_s1, 4  ;;  %s3367_s3 = int_to_ptr.vmem [resolvable:$false] %s3366_s3 }
 0x137   : > { %s3368_s16 = scalar_lea.vmem %s3367_s3, 256  ;;  %p3369_p6 = scmp.lt.s32.totalorder %s3897_s27, %s3367_s3 }
 0x138   : > { %p3364_p1 = pnand %p3362_p12, %p3348_p8  ;;  %p3370_p13 = scmp.lt.s32.totalorder %s3368_s16, %s3361_s11 }
 0x13a   : > { %p3365_p10 = pneg %p3364_p1  ;;  %p3371_p0 = por %p3370_p13, %p3369_p6 }
 0x13c   : > { %p3372_p2 = pnand %p3371_p0, %p3365_p10 }
 0x13e   : > { %3375 = shalt.err (!%p3372_p2)
}
 0x13f   : > { %2956 = dma.hbm_to_vmem [thread:$0]  (!%p3893_p11), %s3891_s8, 128, %s3897_s27, %s742_s22  }
 0x140   : > { %p4357_p3 = scmp.ne.s32.totalorder %s4339_s2, 0 }
 0x141   : > { %s3927_s19 = sand.u32 (!%p4357_p3), 1, %s3454_s30  }
 0x142   : > { %761 = sbr.rel (%p4357_p3) target bundleno = 4671 (0x123f), region = 112  ;;  %s4308_s15 = sshll.u32 (!%p4357_p3), %s3927_s19, 3 }
 0x143   : > { %s764_s23 = scalar_lea.sflag (!%p4357_p3), [#allocation4], %s3927_s19  ;;  %s3933_s11 = scalar_lea.vmem (!%p4357_p3), [#allocation3], %s4308_s15 }
 0x149   : > { %3421 = dma.done.wait (%p3873_p7), %s764_s23, 128  }
 0x14a   : > { %3423 = vsyncadd (%p3873_p7), %s764_s23, 4294967168  ;;  %p4358_p6 = scmp.eq.s32.totalorder %s3634_s26, 0 }
 0x14c   : > { %3425 = dma.done.wait (%p4358_p6), [#allocation7], 512   ;;  %p4359_p10 = pmov %p4358_p6 }
 0x14d   : > { %p4360_p11 = pmov %p4358_p6 }
 0x14e   : > { %3427 = vsyncadd (%p4359_p10), [#allocation7], 4294966784 }
 0x14f   : > { %3429 = dma.done.wait (%p4360_p11), [#allocation10], 272   ;;  %p4361_p8 = pmov %p4358_p6 }
 0x150   : > { %p4362_p5 = pmov %p4358_p6 }
 0x151   : > { %3431 = vsyncadd (%p4361_p8), [#allocation10], 4294967024 }
 0x152   : > { %3433 = dma.done.wait (%p4362_p5), [#allocation13], 32   ;;  %p4363_p9 = pmov %p4362_p5 }
 0x153   : > { %p4364_p7 = pmov %p4362_p5 }
 0x154   : > { %3435 = vsyncadd (%p4363_p9), [#allocation13], 4294967264 }
 0x155   : > { %3437 = dma.done.wait (%p4364_p7), [#allocation16], 272   ;;  %p4365_p4 = pmov %p4362_p5 }
 0x157   : > { %3439 = vsyncadd (%p4365_p4), [#allocation16], 4294967024  ;;  %p4366_p12 = pmov %p4365_p4 }
 0x158   : > { %p4367_p1 = pmov %p4365_p4 }
 0x159   : > { %3441 = dma.done.wait (%p4366_p12), [#allocation19], 16  }
 0x15a   : > { %3443 = vsyncadd (%p4367_p1), [#allocation19], 4294967280  ;;  %p875_p13 = scmp.lt.s32.totalorder %s3634_s26, 1  ;;  %v3476_v0 = vmov 0.0   ;;  %vm3477_vm0 = vmmov 0   ;;  %s4368_s6 = sld [smem:[#allocation28_spill]] }
 0x15b   : > { %2729 = vmatprep.subr.bf16.mxu1 %v3476_v0  ;;  %2733 = vmatprep.mubr.msk.bf16.mxu1 %vm3477_vm0, %v3476_v0  ;;  %v3040_v1 = vld [vmem:[#allocation6] sm:$0xff]   ;;  %v3041_v2 = vld [vmem:[#allocation6 + $0x8] sm:$0xff]   ;;  %vm913_vm1 = vcmask 261120   ;;  %s4369_s16 = sld [smem:[#allocation32_spill]]  ;;  %s3478_s23 = smov 120   ;;  %vm961_vm2 = vcmask 64512  }
 0x15c   : > { %s3964_s2 = scalar_select %p875_p13, %s3634_s26, 1  ;;  %2743 = vmatprep.subr.bf16.mxu0 %v3476_v0  ;;  %2745 = vmatprep.mubr.msk.bf16.mxu0 %vm3477_vm0, %v3476_v0  ;;  %v888_v24 = vld [vmem:[%s3933_s11] sm:$0xff]  ;;  %vm1027_vm3 = vcmask 1043456   ;;  %vm1188_vm4 = vcmask 130112   ;;  %vm1306_vm5 = vcmask 195712   ;;  %vm1424_vm6 = vcmask 261312  }
 0x15d   : > { %2730 = vmatpush3.bf16.msra.mxu1 %v3040_v1  ;;  %s4314_s8 = smov 80   ;;  %s4312_s27 = smov 88   ;;  %vm1709_vm7 = vcmask 130048   ;;  %vm2319_vm8 = vcmask 523264  }
 0x15e   : > { %s2614_s0 = sshll.u32 %s3964_s2, 3  ;;  %2731 = vmatprep.subr.bf16.mxu1 %v3476_v0  ;;  %s3484_s1 = smov 104  }
 0x15f   : > { %s3485_s11 = smov 56   ;;  %s3486_s3 = smov 64  }
 0x160   : > { %s878_s22 = scalar_lea.vmem %s4368_s6, %s2614_s0  ;;  %s4315_s0 = smov 96  }
 0x161   : > { %v3973_v3 = vld [vmem:[%s878_s22] sm:$0xff]  ;;  %2732 = vmatpush3.bf16.msra.mxu1 %v3041_v2  ;;  %s4313_s6 = smov 72   ;;  %s3483_s22 = smov 112  }
 0x162   : > { %v889_v4 = vpack.c.bf16 %v3973_v3, %v3973_v3  ;;  %2737 = vmatprep.subr.bf16.mxu1 %v3476_v0  ;;  %v2617_v5 = vld [vmem:[%s4369_s16] ss:$0 sm:$0xff]  ;;  %s3487_s16 = smov 40   ;;  %s3488_s15 = smov 48  }
 0x163   : > { %s4370_s9 = sld [smem:[#allocation37_spill]]  ;;  %s4388_s10 = sld [smem:[#allocation49_spill]] }
 0x164   : > { %2734 = vmatmul.mubr.msk.bf16.vlgmr.msra.gmra.mrb[0].mxu1 %vm913_vm1, %v889_v4  ;;  %p4389_p2 = scmp.ne.s32.totalorder %s4353_s5, 0 }
 0x165   : > { %2739 = vmatprep.mubr.msk.bf16.mxu1 %vm3477_vm0, %v3476_v0 }
 0x237   : > { %v951_v6 = vpop.f32.mrb[0].mxu1 }
 0x238   : > { %v952_v7 = vadd.f32 %v2617_v5, %v951_v6  ;;  %v2735_v8 = vpop.f32.mrb[1].mxu1 }
 0x239   : > { %v954_v9 = vpop.f32.mrb[2].mxu1 }
 0x23a   : > { %v3985_v10 = vpack.c.bf16 %v952_v7, %v952_v7  ;;  %v2736_v11 = vpop.f32.mrb[3].mxu1 }
 0x23c   : > { %1072 = vrot.lane.b32.xlu1 %v3985_v10, %s3478_s23  ;;  %959 = vrot.lane.b32.xlu0 %v3985_v10, %s4315_s0  ;;  %s4371_s0 = sld [smem:[#allocation29_spill]] }
 0x240   : > { %1192 = vrot.lane.b32.xlu1 %v3985_v10, %s4314_s8  ;;  %1074 = vrot.lane.b32.xlu0 %v3985_v10, %s4312_s27  ;;  %s4373_s8 = smov 80   ;;  %s4374_s27 = smov 72  }
 0x244   : > { %1310 = vrot.lane.b32.xlu1 %v3985_v10, %s4313_s6  ;;  %1190 = vrot.lane.b32.xlu0 %v3985_v10, %s3483_s22  ;;  %s4375_s6 = smov 88  }
 0x248   : > { %1308 = vrot.lane.b32.xlu0 %v3985_v10, %s3484_s1 }
 0x2ae   : > { %v960_v12 = vpop.permute.xlu0 %959  ;;  %v1073_v15 = vpop.permute.xlu1 %1072 }
 0x2af   : > { %v966_v13 = vsel %vm961_vm2, %v960_v12, 0 }
 0x2b0   : > { %2738 = vmatpush3.bf16.xpose.msra.mxu1 %v966_v13 }
 0x2b1   : > { %2749 = vmatprep.subr.bf16.mxu1 %v3476_v0 }
 0x2b2   : > { %v1075_v14 = vpop.permute.xlu0 %1074  ;;  %v1193_v17 = vpop.permute.xlu1 %1192 }
 0x2b3   : > { %v1080_v16 = vsel %vm961_vm2, %v1075_v14, 0  ;;  %v1198_v18 = vsel %vm961_vm2, %v1193_v17, 0 }
 0x2b6   : > { %v1311_v19 = vpop.permute.xlu1 %1310  ;;  %v1191_v20 = vpop.permute.xlu0 %1190 }
 0x2b7   : > { %2740 = vmatmul.mubr.msk.bf16.vlgmr.msra.gmra.mrb[4].mxu1 %vm961_vm2, %v3985_v10  ;;  %v1316_v21 = vsel %vm961_vm2, %v1311_v19, 0 }
 0x2b8   : > { %2750 = vmatpush3.bf16.xpose.msra.mxu1 %v1080_v16  ;;  %2751 = vmatprep.mubr.msk.bf16.mxu1 %vm3477_vm0, %v3476_v0 }
 0x2b9   : > { %2761 = vmatprep.subr.bf16.mxu1 %v3476_v0 }
 0x2ba   : > { %v1309_v22 = vpop.permute.xlu0 %1308 }
 0x2bf   : > { %2752 = vmatmul.mubr.msk.bf16.vlgmr.msra.gmra.mrb[8].mxu1 %vm961_vm2, %v1073_v15 }
 0x2c0   : > { %2762 = vmatpush3.bf16.xpose.msra.mxu1 %v1198_v18  ;;  %2763 = vmatprep.mubr.msk.bf16.mxu1 %vm3477_vm0, %v3476_v0 }
 0x2c1   : > { %2773 = vmatprep.subr.bf16.mxu1 %v3476_v0 }
 0x2c7   : > { %2764 = vmatmul.mubr.msk.bf16.vlgmr.msra.gmra.mrb[12].mxu1 %vm961_vm2, %v1191_v20 }
 0x2c8   : > { %2774 = vmatpush3.bf16.xpose.msra.mxu1 %v1316_v21  ;;  %2775 = vmatprep.mubr.msk.bf16.mxu1 %vm3477_vm0, %v3476_v0 }
 0x2c9   : > { %2785 = vmatprep.subr.bf16.mxu1 %v3476_v0 }
 0x2cf   : > { %2776 = vmatmul.mubr.msk.bf16.vlgmr.msra.gmra.mrb[16].mxu1 %vm961_vm2, %v1309_v22 }
 0x2d0   : > { %2789 = vmatprep.mubr.msk.bf16.mxu1 %vm3477_vm0, %v3476_v0 }
 0x38a   : > { %v1002_v23 = vpop.f32.mrb[4].mxu1 }
 0x38b   : > { %v1008_v25 = vmul.f32 0.35355338, %v1002_v23  ;;  %v2741_v26 = vpop.f32.mrb[5].mxu1 }
 0x38c   : > { %v1005_v27 = vpop.f32.mrb[6].mxu1 }
 0x38d   : > { %v2742_v28 = vpop.f32.mrb[7].mxu1  ;;  %v1009_v29 = vadd.f32 %v1008_v25, %v888_v24 }
 0x38f   : > { %v1010_v30 = vsel %vm961_vm2, %v1009_v29, -inf }
 0x390   : > { %1011 = vmax.xlane.f32.xlu1 %v1010_v30 }
 0x392   : > { %v1116_v31 = vpop.f32.mrb[8].mxu1 }
 0x393   : > { %v1122_v32 = vmul.f32 0.35355338, %v1116_v31  ;;  %v2753_v33 = vpop.f32.mrb[9].mxu1 }
 0x394   : > { %v1119_v34 = vpop.f32.mrb[10].mxu1 }
 0x395   : > { %v2754_v35 = vpop.f32.mrb[11].mxu1  ;;  %v1123_v36 = vadd.f32 %v1122_v32, %v888_v24 }
 0x397   : > { %v1124_v37 = vsel %vm961_vm2, %v1123_v36, -inf }
 0x398   : > { %1125 = vmax.xlane.f32.xlu0 %v1124_v37 }
 0x39a   : > { %v1234_v38 = vpop.f32.mrb[12].mxu1 }
 0x39b   : > { %v1240_v39 = vmul.f32 0.35355338, %v1234_v38  ;;  %v2765_v40 = vpop.f32.mrb[13].mxu1 }
 0x39c   : > { %v1237_v41 = vpop.f32.mrb[14].mxu1 }
 0x39d   : > { %v2766_v42 = vpop.f32.mrb[15].mxu1  ;;  %v1241_v43 = vadd.f32 %v1240_v39, %v888_v24 }
 0x39e   : > { %v3042_v42 = vld [vmem:[#allocation8] sm:$0xff]  }
 0x39f   : > { %v1242_v44 = vsel %vm961_vm2, %v1241_v43, -inf  ;;  %2786 = vmatpush3.bf16.msra.mxu1 %v3042_v42 }
 0x3a0   : > { %1243 = vmax.xlane.f32.xlu0 %v1242_v44  ;;  %2787 = vmatprep.subr.bf16.mxu1 %v3476_v0 }
 0x3a2   : > { %v1352_v45 = vpop.f32.mrb[16].mxu1 }
 0x3a3   : > { %v1358_v46 = vmul.f32 0.35355338, %v1352_v45  ;;  %v2777_v47 = vpop.f32.mrb[17].mxu1 }
 0x3a4   : > { %v1355_v48 = vpop.f32.mrb[18].mxu1 }
 0x3a5   : > { %v2778_v49 = vpop.f32.mrb[19].mxu1  ;;  %v1359_v50 = vadd.f32 %v1358_v46, %v888_v24 }
 0x3a7   : > { %v1360_v51 = vsel %vm961_vm2, %v1359_v50, -inf }
 0x3a8   : > { %1361 = vmax.xlane.f32.xlu1 %v1360_v51 }
 0x41d   : > { %v1012_v52 = vpop.xlane.xlu1 %1011 }
 0x41e   : > { %v1013_v53 = vsub.f32 %v1009_v29, %v1012_v52 }
 0x420   : > { %v1014_v54 = vmul.f32 1.442695, %v1013_v53 }
 0x422   : > { %3056 = vpow2.f32 %v1014_v54 }
 0x425   : > { %v1126_v55 = vpop.xlane.xlu0 %1125 }
 0x426   : > { %v1127_v56 = vsub.f32 %v1123_v36, %v1126_v55 }
 0x428   : > { %v1128_v57 = vmul.f32 1.442695, %v1127_v56 }
 0x42a   : > { %3058 = vpow2.f32 %v1128_v57  ;;  %v2629_v57 = vld [vmem:[#allocation9] ss:$0 sm:$0xff] }
 0x42c   : > { %v3057_v58 = vpop.eup %3056 }
 0x42d   : > { %v1244_v59 = vpop.xlane.xlu0 %1243  ;;  %v1016_v60 = vsel %vm961_vm2, %v3057_v58, 0.0 }
 0x42e   : > { %v1245_v61 = vsub.f32 %v1241_v43, %v1244_v59  ;;  %1017 = vadd.xlane.f32.xlu0 %v1016_v60  ;;  %v3043_v43 = vld [vmem:[#allocation8 + $0x8] sm:$0xff]  }
 0x42f   : > { %2788 = vmatpush3.bf16.msra.mxu1 %v3043_v43 }
 0x430   : > { %v1246_v62 = vmul.f32 1.442695, %v1245_v61  ;;  %2801 = vmatprep.subr.bf16.mxu1 %v3476_v0 }
 0x432   : > { %3060 = vpow2.f32 %v1246_v62 }
 0x434   : > { %v3059_v63 = vpop.eup %3058 }
 0x435   : > { %v1130_v1 = vsel %vm961_vm2, %v3059_v63, 0.0  ;;  %v1362_v5 = vpop.xlane.xlu1 %1361 }
 0x436   : > { %1131 = vadd.xlane.f32.xlu1 %v1130_v1  ;;  %v1363_v6 = vsub.f32 %v1359_v50, %v1362_v5 }
 0x438   : > { %v1364_v7 = vmul.f32 1.442695, %v1363_v6 }
 0x43a   : > { %3062 = vpow2.f32 %v1364_v7 }
 0x43c   : > { %v3061_v2 = vpop.eup %3060 }
 0x43d   : > { %v1248_v4 = vsel %vm961_vm2, %v3061_v2, 0.0 }
 0x43e   : > { %1249 = vadd.xlane.f32.xlu0 %v1248_v4 }
 0x444   : > { %v3063_v8 = vpop.eup %3062 }
 0x445   : > { %v1366_v9 = vsel %vm961_vm2, %v3063_v8, 0.0 }
 0x447   : > { %1136 = vrot.lane.b32.xlu1 %v3985_v10, %s3485_s11  ;;  %s4310_s11 = smov 16  }
 0x454   : > { %1022 = vrot.lane.b32.xlu0 %v3985_v10, %s3486_s3  ;;  %s4309_s3 = smov 24  }
 0x458   : > { %1372 = vrot.lane.b32.xlu0 %v3985_v10, %s3487_s16  ;;  %s4387_s16 = sshll.u32 %s3927_s19, 3 }
 0x46b   : > { %1367 = vadd.xlane.f32.xlu1 %v1366_v9 }
 0x47c   : > { %1254 = vrot.lane.b32.xlu1 %v3985_v10, %s3488_s15  ;;  %s4311_s15 = smov 8  }
 0x4bb   : > { %v1018_v11 = vpop.xlane.xlu0 %1017 }
 0x4bc   : > { %3064 = vrcp.f32 %v1018_v11 }
 0x4c3   : > { %v1132_v12 = vpop.xlane.xlu1 %1131 }
 0x4c4   : > { %3066 = vrcp.f32 %v1132_v12 }
 0x4c6   : > { %v3065_v13 = vpop.eup %3064 }
 0x4c7   : > { %v1020_v15 = vmul.f32 %v3065_v13, %v3057_v58  ;;  %v1137_v18 = vpop.permute.xlu1 %1136  ;;  %v3046_v13 = vld [vmem:[#allocation11] sm:$0xff]  }
 0x4c8   : > { %v1142_v21 = vsel %vm1027_vm3, %v1137_v18, 0 }
 0x4c9   : > { %v1021_v19 = vpack.c.bf16 %v1020_v15, %v1020_v15 }
 0x4cb   : > { %v1250_v14 = vpop.xlane.xlu0 %1249 }
 0x4cc   : > { %3068 = vrcp.f32 %v1250_v14  ;;  %v3047_v14 = vld [vmem:[#allocation11 + $0x8] sm:$0xff]  }
 0x4ce   : > { %v3067_v20 = vpop.eup %3066 }
 0x4cf   : > { %v1023_v16 = vpop.permute.xlu0 %1022  ;;  %v1134_v10 = vmul.f32 %v3067_v20, %v3059_v63 }
 0x4d0   : > { %v1029_v17 = vsel %vm1027_vm3, %v1023_v16, 0 }
 0x4d1   : > { %2744 = vmatpush3.bf16.msra.mxu0 %v1029_v17  ;;  %v1135_v22 = vpack.c.bf16 %v1134_v10, %v1134_v10 }
 0x4d2   : > { %2755 = vmatprep.subr.bf16.mxu0 %v3476_v0 }
 0x4d3   : > { %v1373_v28 = vpop.permute.xlu0 %1372 }
 0x4d4   : > { %2746 = vmatmul.mubr.msk.bf16.vlgmr.msra.gmra.mrb[0].mxu0 %vm961_vm2, %v1021_v19  ;;  %v1378_v30 = vsel %vm1027_vm3, %v1373_v28, 0  ;;  %v2633_v19 = vld [vmem:[#allocation18] ss:$0 sm:$0xff] }
 0x4d5   : > { %2756 = vmatpush3.bf16.msra.mxu0 %v1142_v21  ;;  %2757 = vmatprep.mubr.msk.bf16.mxu0 %vm3477_vm0, %v3476_v0  ;;  %v2634_v21 = vld [vmem:[%s4284_s14] ss:$0 sm:$0xff] }
 0x4d6   : > { %2767 = vmatprep.subr.bf16.mxu0 %v3476_v0  ;;  %v3069_v23 = vpop.eup %3068 }
 0x4d7   : > { %v1252_v25 = vmul.f32 %v3069_v23, %v3061_v2  ;;  %v3044_v2 = vld [vmem:[%s4370_s9] sm:$0xff]  }
 0x4d9   : > { %v1253_v29 = vpack.c.bf16 %v1252_v25, %v1252_v25 }
 0x4dc   : > { %2758 = vmatmul.mubr.msk.bf16.vlgmr.msra.gmra.mrb[4].mxu0 %vm961_vm2, %v1135_v22 }
 0x4dd   : > { %2769 = vmatprep.mubr.msk.bf16.mxu0 %vm3477_vm0, %v3476_v0 }
 0x4f8   : > { %v1368_v24 = vpop.xlane.xlu1 %1367 }
 0x4f9   : > { %3070 = vrcp.f32 %v1368_v24  ;;  %v2639_v24 = vld [vmem:[#allocation14] ss:$0 sm:$0xff] }
 0x4fc   : > { %v1255_v26 = vpop.permute.xlu1 %1254 }
 0x4fd   : > { %v1260_v27 = vsel %vm1027_vm3, %v1255_v26, 0 }
 0x4fe   : > { %2768 = vmatpush3.bf16.msra.mxu0 %v1260_v27 }
 0x4ff   : > { %2779 = vmatprep.subr.bf16.mxu0 %v3476_v0 }
 0x501   : > { %2770 = vmatmul.mubr.msk.bf16.vlgmr.msra.gmra.mrb[8].mxu0 %vm961_vm2, %v1253_v29 }
 0x502   : > { %2780 = vmatpush3.bf16.msra.mxu0 %v1378_v30  ;;  %2781 = vmatprep.mubr.msk.bf16.mxu0 %vm3477_vm0, %v3476_v0 }
 0x503   : > { %v3071_v31 = vpop.eup %3070  ;;  %2793 = vmatprep.subr.bf16.mxu0 %v3476_v0 }
 0x504   : > { %v1370_v32 = vmul.f32 %v3071_v31, %v3063_v8 }
 0x506   : > { %v1371_v33 = vpack.c.bf16 %v1370_v32, %v1370_v32 }
 0x509   : > { %2782 = vmatmul.mubr.msk.bf16.vlgmr.msra.gmra.mrb[12].mxu0 %vm961_vm2, %v1371_v33  ;;  %v2635_v33 = vld [vmem:[#allocation12] ss:$0 sm:$0xff] }
 0x50a   : > { %2797 = vmatprep.mubr.msk.bf16.mxu0 %vm3477_vm0, %v3476_v0  ;;  %2794 = vmatpush3.bf16.msra.mxu0 %v3046_v13 }
 0x50b   : > { %2795 = vmatprep.subr.bf16.mxu0 %v3476_v0 }
 0x50e   : > { %2796 = vmatpush3.bf16.msra.mxu0 %v3047_v14 }
 0x50f   : > { %2809 = vmatprep.subr.bf16.mxu0 %v3476_v0 }
 0x5a7   : > { %v1065_v34 = vpop.f32.mrb[0].mxu0 }
 0x5a8   : > { %1071 = vst.msk [vmem:[#allocation2] sm:$0xff] %vm961_vm2, %v1065_v34  ;;  %v2747_v35 = vpop.f32.mrb[1].mxu0 }
 0x5a9   : > { %v1068_v36 = vpop.f32.mrb[2].mxu0 }
 0x5aa   : > { %v2748_v37 = vpop.f32.mrb[3].mxu0 }
 0x5af   : > { %v1178_v38 = vpop.f32.mrb[4].mxu0 }
 0x5b0   : > { %1185 = vrot.lane.b32.xlu1 %v1178_v38, %s4311_s15  ;;  %v2759_v39 = vpop.f32.mrb[5].mxu0  ;;  %s4378_s15 = smov 24  }
 0x5b1   : > { %v1181_v40 = vpop.f32.mrb[6].mxu0 }
 0x5b2   : > { %v2760_v41 = vpop.f32.mrb[7].mxu0 }
 0x5d4   : > { %v1296_v44 = vpop.f32.mrb[8].mxu0 }
 0x5d5   : > { %1303 = vrot.lane.b32.xlu0 %v1296_v44, %s4310_s11  ;;  %v2771_v45 = vpop.f32.mrb[9].mxu0  ;;  %s2673_s11 = sshll.u32 %s3964_s2, 4  ;;  %s874_s2 = scalar_lea.vmem [#allocation20], %s4387_s16 }
 0x5d6   : > { %v1299_v46 = vpop.f32.mrb[10].mxu0 }
 0x5d7   : > { %v2772_v47 = vpop.f32.mrb[11].mxu0 }
 0x5dc   : > { %v1414_v48 = vpop.f32.mrb[12].mxu0 }
 0x5dd   : > { %1421 = vrot.lane.b32.xlu1 %v1414_v48, %s4309_s3  ;;  %v2783_v49 = vpop.f32.mrb[13].mxu0  ;;  %s883_s3 = scalar_lea.vmem %s4371_s0, %s2673_s11  ;;  %s4381_s11 = sld [smem:[#allocation41_spill]] }
 0x5de   : > { %v1417_v50 = vpop.f32.mrb[14].mxu0  ;;  %v886_v9 = vld [vmem:[%s883_s3] sm:$0xff]  ;;  %v887_v11 = vld [vmem:[%s883_s3 + $0x8] sm:$0xff]  ;;  %s4379_s3 = sld [smem:[#allocation45_spill]]  ;;  %s4382_s0 = sld [smem:[#allocation42_spill]] }
 0x5df   : > { %v2784_v51 = vpop.f32.mrb[15].mxu0  ;;  %v1526_v12 = vpack.c.bf16 %v887_v11, %v886_v9 }
 0x622   : > { %v1186_v52 = vpop.permute.xlu1 %1185 }
 0x623   : > { %1189 = vst.msk [vmem:[#allocation2] sm:$0xff] %vm1188_vm4, %v1186_v52 }
 0x647   : > { %v1304_v53 = vpop.permute.xlu0 %1303 }
 0x648   : > { %1307 = vst.msk [vmem:[#allocation2] sm:$0xff] %vm1306_vm5, %v1304_v53 }
 0x64f   : > { %v1422_v54 = vpop.permute.xlu1 %1421 }
 0x650   : > { %1425 = vst.msk [vmem:[#allocation2] sm:$0xff] %vm1424_vm6, %v1422_v54 }
 0x657   : > { %v1426_v55 = vld [vmem:[#allocation2] sm:$0xff] }
 0x658   : > { %v1427_v56 = vpack.c.bf16 %v1426_v55, %v1426_v55 }
 0x65a   : > { %2790 = vmatmul.mubr.msk.bf16.vlgmr.msra.gmra.mrb[20].mxu1 %vm913_vm1, %v1427_v56 }
 0x65b   : > { %2805 = vmatprep.mubr.msk.bf16.mxu1 %vm3477_vm0, %v3476_v0  ;;  %2802 = vmatpush3.bf16.msra.mxu1 %v3044_v2 }
 0x65c   : > { %2803 = vmatprep.subr.bf16.mxu1 %v3476_v0 }
 0x72d   : > { %v1488_v58 = vpop.f32.mrb[20].mxu1 }
 0x72e   : > { %v1489_v59 = vadd.f32 %v2629_v57, %v1488_v58  ;;  %v2791_v60 = vpop.f32.mrb[21].mxu1 }
 0x72f   : > { %v1491_v61 = vpop.f32.mrb[22].mxu1 }
 0x730   : > { %v2792_v62 = vpop.f32.mrb[23].mxu1  ;;  %v1494_v63 = vadd.f32 %v1489_v59, %v3973_v3  ;;  %v3045_v3 = vld [vmem:[%s4370_s9 + $0x8] sm:$0xff]  }
 0x731   : > { %2804 = vmatpush3.bf16.msra.mxu1 %v3045_v3 }
 0x732   : > { %v1497_v1 = vsel %vm913_vm1, %v1494_v63, 0.0  ;;  %2815 = vmatprep.subr.bf16.mxu1 %v3476_v0 }
 0x733   : > { %1498 = vadd.xlane.f32.xlu0 %v1497_v1 }
 0x734   : > { %2806 = vmatmul.mubr.msk.bf16.vlgmr.msra.gmra.mrb[24].mxu1 %vm913_vm1, %v1526_v12 }
 0x735   : > { %2817 = vmatprep.mubr.msk.bf16.mxu1 %vm3477_vm0, %v3476_v0 }
 0x7c0   : > { %v1499_v4 = vpop.xlane.xlu0 %1498 }
 0x7c1   : > { %v1501_v5 = vmul.f32 0.03125, %v1499_v4 }
 0x7c3   : > { %v1502_v6 = vsub.f32 %v1494_v63, %v1501_v5 }
 0x7c5   : > { %v1503_v7 = vmul.f32 %v1502_v6, %v1502_v6 }
 0x7c7   : > { %v1504_v8 = vsel %vm913_vm1, %v1503_v7, 0.0 }
 0x7c8   : > { %1505 = vadd.xlane.f32.xlu1 %v1504_v8 }
 0x807   : > { %v1653_v25 = vpop.f32.mrb[24].mxu1 }
 0x808   : > { %v1654_v26 = vadd.f32 %v2639_v24, %v1653_v25  ;;  %v2807_v27 = vpop.f32.mrb[25].mxu1 }
 0x809   : > { %v1656_v28 = vpop.f32.mrb[26].mxu1 }
 0x80a   : > { %v1657_v29 = vadd.f32 %v2639_v24, %v1656_v28  ;;  %v2808_v30 = vpop.f32.mrb[27].mxu1 }
 0x80c   : > { %v4097_v31 = vpack.c.bf16 %v1657_v29, %v1654_v26 }
 0x80e   : > { %1773 = vrot.lane.b32.xlu0 %v4097_v31, %s3478_s23  ;;  %v1666_v32 = vsel %vm961_vm2, %v4097_v31, 0 }
 0x812   : > { %1887 = vrot.lane.b32.xlu0 %v4097_v31, %s3483_s22 }
 0x816   : > { %2001 = vrot.lane.b32.xlu0 %v4097_v31, %s3484_s1 }
 0x855   : > { %v1506_v15 = vpop.xlane.xlu1 %1505 }
 0x856   : > { %v1507_v16 = vmul.f32 0.03125, %v1506_v15 }
 0x858   : > { %v1508_v17 = vadd.f32 1e-05, %v1507_v16 }
 0x85a   : > { %3072 = vrsqrt.f32 %v1508_v17 }
 0x864   : > { %v3073_v18 = vpop.eup %3072 }
 0x865   : > { %v1510_v20 = vmul.f32 %v3073_v18, %v1502_v6 }
 0x867   : > { %v1517_v10 = vmul.f32 %v2633_v19, %v1510_v20 }
 0x869   : > { %v4090_v22 = vadd.f32 %v2634_v21, %v1517_v10 }
 0x86b   : > { %v1525_v23 = vpack.c.bf16 %v4090_v22, %v4090_v22 }
 0x86d   : > { %2798 = vmatmul.mubr.msk.bf16.vlgmr.msra.gmra.mrb[16].mxu0 %vm913_vm1, %v1525_v23 }
 0x86e   : > { %2811 = vmatprep.mubr.msk.bf16.mxu0 %vm3477_vm0, %v3476_v0  ;;  %2810 = vmatpush3.bf16.xpose.msra.mxu0 %v1666_v32 }
 0x86f   : > { %2821 = vmatprep.subr.bf16.mxu0 %v3476_v0 }
 0x880   : > { %v1774_v38 = vpop.permute.xlu0 %1773 }
 0x881   : > { %v1779_v41 = vsel %vm961_vm2, %v1774_v38, 0 }
 0x884   : > { %v1888_v42 = vpop.permute.xlu0 %1887 }
 0x885   : > { %v1893_v44 = vsel %vm961_vm2, %v1888_v42, 0 }
 0x888   : > { %v2002_v45 = vpop.permute.xlu0 %2001 }
 0x889   : > { %v2007_v47 = vsel %vm961_vm2, %v2002_v45, 0 }
 0x940   : > { %v1587_v34 = vpop.f32.mrb[16].mxu0 }
 0x941   : > { %v1588_v35 = vadd.f32 %v2635_v33, %v1587_v34  ;;  %v2799_v36 = vpop.f32.mrb[17].mxu0 }
 0x942   : > { %v1590_v37 = vpop.f32.mrb[18].mxu0 }
 0x943   : > { %v1660_v39 = vpack.c.bf16 %v1588_v35, %v1588_v35  ;;  %v2800_v40 = vpop.f32.mrb[19].mxu0 }
 0x945   : > { %1771 = vrot.lane.b32.xlu1 %v1660_v39, %s3478_s23  ;;  %2812 = vmatmul.mubr.msk.bf16.vlgmr.msra.gmra.mrb[20].mxu0 %vm961_vm2, %v1660_v39  ;;  %s4372_s23 = smov 96  }
 0x946   : > { %2822 = vmatpush3.bf16.xpose.msra.mxu0 %v1779_v41  ;;  %2823 = vmatprep.mubr.msk.bf16.mxu0 %vm3477_vm0, %v3476_v0 }
 0x947   : > { %2833 = vmatprep.subr.bf16.mxu0 %v3476_v0 }
 0x949   : > { %1885 = vrot.lane.b32.xlu1 %v1660_v39, %s3483_s22  ;;  %s4376_s22 = smov 8  }
 0x94d   : > { %1999 = vrot.lane.b32.xlu1 %v1660_v39, %s3484_s1  ;;  %s4377_s1 = smov 16  }
 0x9b7   : > { %v1772_v43 = vpop.permute.xlu1 %1771 }
 0x9b8   : > { %2824 = vmatmul.mubr.msk.bf16.vlgmr.msra.gmra.mrb[24].mxu0 %vm961_vm2, %v1772_v43 }
 0x9b9   : > { %2834 = vmatpush3.bf16.xpose.msra.mxu0 %v1893_v44  ;;  %2835 = vmatprep.mubr.msk.bf16.mxu0 %vm3477_vm0, %v3476_v0 }
 0x9ba   : > { %2845 = vmatprep.subr.bf16.mxu0 %v3476_v0 }
 0x9bb   : > { %v1886_v46 = vpop.permute.xlu1 %1885 }
 0x9bf   : > { %v2000_v48 = vpop.permute.xlu1 %1999 }
 0x9c0   : > { %2836 = vmatmul.mubr.msk.bf16.vlgmr.msra.gmra.mrb[28].mxu0 %vm961_vm2, %v1886_v46 }
 0x9c1   : > { %2846 = vmatpush3.bf16.xpose.msra.mxu0 %v2007_v47  ;;  %2847 = vmatprep.mubr.msk.bf16.mxu0 %vm3477_vm0, %v3476_v0 }
 0x9c2   : > { %2857 = vmatprep.subr.bf16.mxu0 %v3476_v0 }
 0x9c8   : > { %2848 = vmatmul.mubr.msk.bf16.vlgmr.msra.gmra.mrb[32].mxu0 %vm961_vm2, %v2000_v48 }
 0x9c9   : > { %2861 = vmatprep.mubr.msk.bf16.mxu0 %vm3477_vm0, %v3476_v0 }
 0xa18   : > { %v1702_v49 = vpop.f32.mrb[20].mxu0 }
 0xa19   : > { %v1708_v50 = vmul.f32 0.35355338, %v1702_v49  ;;  %v2813_v51 = vpop.f32.mrb[21].mxu0 }
 0xa1a   : > { %v1705_v52 = vpop.f32.mrb[22].mxu0 }
 0xa1b   : > { %v2814_v53 = vpop.f32.mrb[23].mxu0  ;;  %v1710_v54 = vsel %vm1709_vm7, %v1708_v50, -inf }
 0xa1c   : > { %1711 = vmax.xlane.f32.xlu0 %v1710_v54 }
 0xa8b   : > { %v1815_v55 = vpop.f32.mrb[24].mxu0 }
 0xa8c   : > { %v1821_v56 = vmul.f32 0.35355338, %v1815_v55  ;;  %v2825_v57 = vpop.f32.mrb[25].mxu0 }
 0xa8d   : > { %v1818_v58 = vpop.f32.mrb[26].mxu0 }
 0xa8e   : > { %v2826_v59 = vpop.f32.mrb[27].mxu0  ;;  %v1822_v60 = vsel %vm1709_vm7, %v1821_v56, -inf }
 0xa8f   : > { %1823 = vmax.xlane.f32.xlu1 %v1822_v60  ;;  %v3048_v59 = vld [vmem:[#allocation15] sm:$0xff]   ;;  %v3049_v60 = vld [vmem:[#allocation15 + $0x8] sm:$0xff]  }
 0xa90   : > { %2858 = vmatpush3.bf16.msra.mxu0 %v3048_v59 }
 0xa91   : > { %2859 = vmatprep.subr.bf16.mxu0 %v3476_v0 }
 0xa93   : > { %v1929_v61 = vpop.f32.mrb[28].mxu0 }
 0xa94   : > { %v1935_v62 = vmul.f32 0.35355338, %v1929_v61  ;;  %v2837_v63 = vpop.f32.mrb[29].mxu0  ;;  %2860 = vmatpush3.bf16.msra.mxu0 %v3049_v60 }
 0xa95   : > { %v1932_v1 = vpop.f32.mrb[30].mxu0  ;;  %2873 = vmatprep.subr.bf16.mxu0 %v3476_v0 }
 0xa96   : > { %v2838_v2 = vpop.f32.mrb[31].mxu0  ;;  %v1936_v4 = vsel %vm1709_vm7, %v1935_v62, -inf }
 0xa97   : > { %1937 = vmax.xlane.f32.xlu0 %v1936_v4 }
 0xa9b   : > { %v2043_v5 = vpop.f32.mrb[32].mxu0 }
 0xa9c   : > { %v2049_v6 = vmul.f32 0.35355338, %v2043_v5  ;;  %v2849_v7 = vpop.f32.mrb[33].mxu0 }
 0xa9d   : > { %v2046_v8 = vpop.f32.mrb[34].mxu0 }
 0xa9e   : > { %v2850_v3 = vpop.f32.mrb[35].mxu0  ;;  %v2050_v9 = vsel %vm1709_vm7, %v2049_v6, -inf }
 0xa9f   : > { %2051 = vmax.xlane.f32.xlu0 %v2050_v9 }
 0xaa9   : > { %v1712_v11 = vpop.xlane.xlu0 %1711 }
 0xaaa   : > { %v1713_v12 = vsub.f32 %v1708_v50, %v1712_v11 }
 0xaac   : > { %v1714_v13 = vmul.f32 1.442695, %v1713_v12  ;;  %v2651_v12 = vld [vmem:[#allocation17] ss:$0 sm:$0xff] }
 0xaae   : > { %3074 = vpow2.f32 %v1714_v13 }
 0xab8   : > { %v3075_v14 = vpop.eup %3074 }
 0xab9   : > { %v1716_v15 = vsel %vm1709_vm7, %v3075_v14, 0.0 }
 0xaba   : > { %1717 = vadd.xlane.f32.xlu1 %v1716_v15 }
 0xacb   : > { %1723 = vrot.lane.b32.xlu1 %v4097_v31, %s4372_s23  ;;  %s2395_s23 = scalar_lea.sflag [#allocation5], %s3927_s19 }
 0xb1c   : > { %v1824_v16 = vpop.xlane.xlu1 %1823 }
 0xb1d   : > { %v1825_v17 = vsub.f32 %v1821_v56, %v1824_v16 }
 0xb1f   : > { %v1826_v18 = vmul.f32 1.442695, %v1825_v17 }
 0xb21   : > { %3076 = vpow2.f32 %v1826_v18 }
 0xb24   : > { %v1938_v19 = vpop.xlane.xlu0 %1937 }
 0xb25   : > { %v1939_v20 = vsub.f32 %v1935_v62, %v1938_v19 }
 0xb27   : > { %v1940_v21 = vmul.f32 1.442695, %v1939_v20 }
 0xb29   : > { %3078 = vpow2.f32 %v1940_v21 }
 0xb2b   : > { %v3077_v10 = vpop.eup %3076 }
 0xb2c   : > { %v2052_v23 = vpop.xlane.xlu0 %2051  ;;  %v1828_v24 = vsel %vm1709_vm7, %v3077_v10, 0.0 }
 0xb2d   : > { %v2053_v25 = vsub.f32 %v2049_v6, %v2052_v23  ;;  %1829 = vadd.xlane.f32.xlu0 %v1828_v24 }
 0xb2f   : > { %v2054_v26 = vmul.f32 1.442695, %v2053_v25  ;;  %v3050_v25 = vld [vmem:[%s4379_s3] sm:$0xff]  }
 0xb31   : > { %3080 = vpow2.f32 %v2054_v26  ;;  %v3051_v26 = vld [vmem:[%s4379_s3 + $0x8] sm:$0xff]  }
 0xb33   : > { %v3079_v27 = vpop.eup %3078 }
 0xb34   : > { %v1942_v28 = vsel %vm1709_vm7, %v3079_v27, 0.0 }
 0xb35   : > { %1943 = vadd.xlane.f32.xlu1 %v1942_v28 }
 0xb3b   : > { %v3081_v29 = vpop.eup %3080 }
 0xb3c   : > { %v2056_v30 = vsel %vm1709_vm7, %v3081_v29, 0.0 }
 0xb3d   : > { %2057 = vadd.xlane.f32.xlu0 %v2056_v30 }
 0xb46   : > { %1948 = vrot.lane.b32.xlu1 %v4097_v31, %s4373_s8 }
 0xb47   : > { %v1718_v32 = vpop.xlane.xlu1 %1717 }
 0xb48   : > { %3082 = vrcp.f32 %v1718_v32 }
 0xb4a   : > { %2062 = vrot.lane.b32.xlu1 %v4097_v31, %s4374_s27  ;;  %s4380_s27 = sld [smem:[#allocation47_spill]] }
 0xb4b   : > { %v1724_v33 = vpop.permute.xlu1 %1723 }
 0xb4c   : > { %2816 = vmatpush3.bf16.msra.mxu1 %v1724_v33  ;;  %v2655_v33 = vld [vmem:[%s4381_s11] ss:$0 sm:$0xff]  ;;  %s4383_s11 = sld [smem:[#allocation46_spill]] }
 0xb4d   : > { %2827 = vmatprep.subr.bf16.mxu1 %v3476_v0 }
 0xb52   : > { %v3083_v34 = vpop.eup %3082 }
 0xb53   : > { %v1720_v35 = vmul.f32 %v3083_v34, %v3075_v14  ;;  %1834 = vrot.lane.b32.xlu0 %v4097_v31, %s4375_s6  ;;  %s4385_s6 = sld [smem:[#allocation43_spill]] }
 0xb55   : > { %v1721_v36 = vpack.c.bf16 %v1720_v35, %v1720_v35  ;;  %v2656_v35 = vld [vmem:[%s4382_s0] ss:$0 sm:$0xff]  ;;  %s4384_s0 = sld [smem:[#allocation48_spill]] }
 0xb57   : > { %2818 = vmatmul.mubr.msk.bf16.vlgmr.msra.gmra.mrb[28].mxu1 %vm1709_vm7, %v1721_v36 }
 0xb58   : > { %2829 = vmatprep.mubr.msk.bf16.mxu1 %vm3477_vm0, %v3476_v0 }
 0xbba   : > { %v1830_v37 = vpop.xlane.xlu0 %1829 }
 0xbbb   : > { %3084 = vrcp.f32 %v1830_v37 }
 0xbc2   : > { %v1944_v38 = vpop.xlane.xlu1 %1943 }
 0xbc3   : > { %3086 = vrcp.f32 %v1944_v38 }
 0xbc5   : > { %v3085_v39 = vpop.eup %3084 }
 0xbc6   : > { %v1832_v41 = vmul.f32 %v3085_v39, %v3077_v10  ;;  %v1949_v44 = vpop.permute.xlu1 %1948  ;;  %v3054_v39 = vld [vmem:[%s4380_s27 + $0x10] sm:$0xff]  }
 0xbc8   : > { %v1833_v43 = vpack.c.bf16 %v1832_v41, %v1832_v41  ;;  %v2657_v41 = vld [vmem:[%s4383_s11] ss:$0 sm:$0xff]  ;;  %s2670_s11 = sshll.u32 %s3634_s26, 7  ;;  %s3492_s26 = smov [#allocation20]  }
 0xbc9   : > { %s4225_s12 = scalar_lea.hbm %s4388_s10, %s2670_s11 }
 0xbca   : > { %v2058_v40 = vpop.xlane.xlu0 %2057  ;;  %v2063_v48 = vpop.permute.xlu1 %2062 }
 0xbcb   : > { %3088 = vrcp.f32 %v2058_v40  ;;  %v3055_v40 = vld [vmem:[%s4380_s27 + $0x18] sm:$0xff]  }
 0xbcd   : > { %v3087_v31 = vpop.eup %3086 }
 0xbce   : > { %v1835_v42 = vpop.permute.xlu0 %1834  ;;  %v1946_v45 = vmul.f32 %v3087_v31, %v3079_v27  ;;  %v3053_v27 = vld [vmem:[%s4380_s27 + $0x8] sm:$0xff]  }
 0xbcf   : > { %2828 = vmatpush3.bf16.msra.mxu1 %v1835_v42 }
 0xbd0   : > { %2839 = vmatprep.subr.bf16.mxu1 %v3476_v0  ;;  %v1947_v46 = vpack.c.bf16 %v1946_v45, %v1946_v45 }
 0xbd2   : > { %2830 = vmatmul.mubr.msk.bf16.vlgmr.msra.gmra.mrb[32].mxu1 %vm1709_vm7, %v1833_v43 }
 0xbd3   : > { %2840 = vmatpush3.bf16.msra.mxu1 %v1949_v44  ;;  %2841 = vmatprep.mubr.msk.bf16.mxu1 %vm3477_vm0, %v3476_v0 }
 0xbd4   : > { %2851 = vmatprep.subr.bf16.mxu1 %v3476_v0 }
 0xbd5   : > { %v3089_v47 = vpop.eup %3088 }
 0xbd6   : > { %v2060_v49 = vmul.f32 %v3089_v47, %v3081_v29 }
 0xbd8   : > { %v2061_v50 = vpack.c.bf16 %v2060_v49, %v2060_v49 }
 0xbda   : > { %2842 = vmatmul.mubr.msk.bf16.vlgmr.msra.gmra.mrb[36].mxu1 %vm1709_vm7, %v1947_v46 }
 0xbdb   : > { %2852 = vmatpush3.bf16.msra.mxu1 %v2063_v48  ;;  %2853 = vmatprep.mubr.msk.bf16.mxu1 %vm3477_vm0, %v3476_v0 }
 0xbdc   : > { %2865 = vmatprep.subr.bf16.mxu1 %v3476_v0 }
 0xbe2   : > { %2854 = vmatmul.mubr.msk.bf16.vlgmr.msra.gmra.mrb[40].mxu1 %vm1709_vm7, %v2061_v50 }
 0xbe3   : > { %2869 = vmatprep.mubr.msk.bf16.mxu1 %vm3477_vm0, %v3476_v0  ;;  %2866 = vmatpush3.bf16.msra.mxu1 %v3050_v25 }
 0xbe4   : > { %2867 = vmatprep.subr.bf16.mxu1 %v3476_v0 }
 0xbe7   : > { %2868 = vmatpush3.bf16.msra.mxu1 %v3051_v26 }
 0xc2a   : > { %v1763_v51 = vpop.f32.mrb[28].mxu1 }
 0xc2b   : > { %1769 = vst.msk [vmem:[#allocation2] sm:$0xff] %vm961_vm2, %v1763_v51  ;;  %v2819_v52 = vpop.f32.mrb[29].mxu1 }
 0xc2c   : > { %v1766_v53 = vpop.f32.mrb[30].mxu1 }
 0xc2d   : > { %v2820_v54 = vpop.f32.mrb[31].mxu1 }
 0xca5   : > { %v1874_v55 = vpop.f32.mrb[32].mxu1 }
 0xca6   : > { %1881 = vrot.lane.b32.xlu0 %v1874_v55, %s4376_s22  ;;  %v2831_v56 = vpop.f32.mrb[33].mxu1 }
 0xca7   : > { %v1877_v57 = vpop.f32.mrb[34].mxu1 }
 0xca8   : > { %v2832_v58 = vpop.f32.mrb[35].mxu1 }
 0xcad   : > { %v1988_v61 = vpop.f32.mrb[36].mxu1 }
 0xcae   : > { %1995 = vrot.lane.b32.xlu1 %v1988_v61, %s4377_s1  ;;  %v2843_v62 = vpop.f32.mrb[37].mxu1 }
 0xcaf   : > { %v1991_v63 = vpop.f32.mrb[38].mxu1 }
 0xcb0   : > { %v2844_v1 = vpop.f32.mrb[39].mxu1 }
 0xcb1   : > { %v2667_v1 = vld [vmem:[%s4385_s6] ss:$0 sm:$0xff]  ;;  %s3380_s6 = sshll.u32 %s3492_s26, 4  ;;  %s3381_s6 = int_to_ptr.vmem [resolvable:$false] %s3380_s6 }
 0xcb2   : > { %s3382_s22 = scalar_lea.vmem %s3381_s6, 256 }
 0xcb5   : > { %v2102_v2 = vpop.f32.mrb[40].mxu1 }
 0xcb6   : > { %2109 = vrot.lane.b32.xlu0 %v2102_v2, %s4378_s15  ;;  %v2855_v4 = vpop.f32.mrb[41].mxu1  ;;  %s4386_s15 = sld [smem:[#allocation44_spill]] }
 0xcb7   : > { %v2105_v5 = vpop.f32.mrb[42].mxu1 }
 0xcb8   : > { %v2856_v6 = vpop.f32.mrb[43].mxu1 }
 0xcbc   : > { %v2668_v4 = vld [vmem:[%s4386_s15] ss:$0 sm:$0xff] }
 0xd18   : > { %v1882_v7 = vpop.permute.xlu0 %1881 }
 0xd19   : > { %1884 = vst.msk [vmem:[#allocation2] sm:$0xff] %vm1188_vm4, %v1882_v7 }
 0xd20   : > { %v1996_v8 = vpop.permute.xlu1 %1995 }
 0xd21   : > { %1998 = vst.msk [vmem:[#allocation2] sm:$0xff] %vm1306_vm5, %v1996_v8 }
 0xd28   : > { %v2110_v3 = vpop.permute.xlu0 %2109 }
 0xd29   : > { %2112 = vst.msk [vmem:[#allocation2] sm:$0xff] %vm1424_vm6, %v2110_v3 }
 0xd30   : > { %v2113_v9 = vld [vmem:[#allocation2] sm:$0xff] }
 0xd31   : > { %v2114_v11 = vpack.c.bf16 %v2113_v9, %v2113_v9 }
 0xd33   : > { %2862 = vmatmul.mubr.msk.bf16.vlgmr.msra.gmra.mrb[36].mxu0 %vm913_vm1, %v2114_v11 }
 0xd34   : > { %2881 = vmatprep.mubr.msk.bf16.mxu0 %vm3477_vm0, %v3476_v0 }
 0xe06   : > { %v2175_v13 = vpop.f32.mrb[36].mxu0 }
 0xe07   : > { %v2176_v14 = vadd.f32 %v2651_v12, %v2175_v13  ;;  %v2863_v15 = vpop.f32.mrb[37].mxu0 }
 0xe08   : > { %v2178_v16 = vpop.f32.mrb[38].mxu0 }
 0xe09   : > { %v2864_v17 = vpop.f32.mrb[39].mxu0  ;;  %v2181_v18 = vadd.f32 %v2176_v14, %v4090_v22  ;;  %v3052_v22 = vld [vmem:[%s4380_s27] sm:$0xff]  }
 0xe0a   : > { %2874 = vmatpush3.bf16.msra.mxu0 %v3052_v22 }
 0xe0b   : > { %v2184_v19 = vsel %vm913_vm1, %v2181_v18, 0.0  ;;  %2875 = vmatprep.subr.bf16.mxu0 %v3476_v0 }
 0xe0c   : > { %2185 = vadd.xlane.f32.xlu1 %v2184_v19 }
 0xe0e   : > { %2876 = vmatpush3.bf16.msra.mxu0 %v3053_v27 }
 0xe0f   : > { %2877 = vmatprep.subr.bf16.mxu0 %v3476_v0 }
 0xe12   : > { %2878 = vmatpush3.bf16.msra.mxu0 %v3054_v39 }
 0xe13   : > { %2879 = vmatprep.subr.bf16.mxu0 %v3476_v0  ;;  %v2661_v0 = vld [vmem:[%s4384_s0] ss:$0 sm:$0xff]  ;;  %s2408_s0 = sshll.u32 %s874_s2, 4  ;;  %s4227_s0 = int_to_ptr.vmem [resolvable:$true] %s2408_s0 }
 0xe14   : > { %s3376_s8 = scalar_lea.vmem %s4227_s0, 128  ;;  %p3383_p10 = scmp.lt.s32.totalorder %s4227_s0, %s3381_s6 }
 0xe15   : > { %p3377_p0 = scmp.ne.s32.totalorder %s4227_s0, %s3376_s8  ;;  %p3384_p11 = scmp.lt.s32.totalorder %s3382_s22, %s3376_s8 }
 0xe16   : > { %2880 = vmatpush3.bf16.msra.mxu0 %v3055_v40 }
 0xe17   : > { %p3378_p3 = pnand %p3377_p0, %p4389_p2  ;;  %p3385_p8 = por %p3384_p11, %p3383_p10 }
 0xe19   : > { %p3379_p6 = pneg %p3378_p3 }
 0xe1b   : > { %p3386_p5 = pnand %p3385_p8, %p3379_p6 }
 0xe99   : > { %v2186_v20 = vpop.xlane.xlu1 %2185 }
 0xe9a   : > { %v2187_v21 = vmul.f32 0.03125, %v2186_v20 }
 0xe9c   : > { %v2188_v10 = vsub.f32 %v2181_v18, %v2187_v21 }
 0xe9e   : > { %v2189_v23 = vmul.f32 %v2188_v10, %v2188_v10 }
 0xea0   : > { %v2190_v24 = vsel %vm913_vm1, %v2189_v23, 0.0 }
 0xea1   : > { %2191 = vadd.xlane.f32.xlu0 %v2190_v24 }
 0xf2e   : > { %v2192_v28 = vpop.xlane.xlu0 %2191 }
 0xf2f   : > { %v2193_v29 = vmul.f32 0.03125, %v2192_v28 }
 0xf31   : > { %v2194_v30 = vadd.f32 1e-05, %v2193_v29 }
 0xf33   : > { %3090 = vrsqrt.f32 %v2194_v30 }
 0xf3d   : > { %v3091_v32 = vpop.eup %3090 }
 0xf3e   : > { %v2196_v34 = vmul.f32 %v3091_v32, %v2188_v10 }
 0xf40   : > { %v2203_v36 = vmul.f32 %v2655_v33, %v2196_v34 }
 0xf42   : > { %v2210_v37 = vadd.f32 %v2656_v35, %v2203_v36 }
 0xf44   : > { %v2211_v38 = vpack.c.bf16 %v2210_v37, %v2210_v37 }
 0xf46   : > { %2870 = vmatmul.mubr.msk.bf16.vlgmr.msra.gmra.mrb[44].mxu1 %vm913_vm1, %v2211_v38 }
0x1019   : > { %v2272_v42 = vpop.f32.mrb[44].mxu1 }
0x101a   : > { %v2273_v43 = vadd.f32 %v2657_v41, %v2272_v42  ;;  %v2871_v31 = vpop.f32.mrb[45].mxu1 }
0x101b   : > { %v2275_v44 = vpop.f32.mrb[46].mxu1 }
0x101c   : > { %v2278_v45 = vmax.f32 %v2273_v43, 0.0  ;;  %v2872_v46 = vpop.f32.mrb[47].mxu1 }
0x101e   : > { %v2279_v47 = vpack.c.bf16 %v2278_v45, %v2278_v45 }
0x1020   : > { %2882 = vmatmul.mubr.msk.bf16.vlgmr.msra.gmra.mrb[40].mxu0 %vm2319_vm8, %v2279_v47 }
0x10f3   : > { %v2357_v48 = vpop.f32.mrb[40].mxu0 }
0x10f4   : > { %v2358_v49 = vadd.f32 %v2661_v0, %v2357_v48  ;;  %v2883_v50 = vpop.f32.mrb[41].mxu0 }
0x10f5   : > { %v2360_v51 = vpop.f32.mrb[42].mxu0 }
0x10f6   : > { %v2884_v52 = vpop.f32.mrb[43].mxu0  ;;  %v2363_v53 = vadd.f32 %v2358_v49, %v2210_v37 }
0x10f8   : > { %v2366_v54 = vsel %vm913_vm1, %v2363_v53, 0.0 }
0x10f9   : > { %2367 = vadd.xlane.f32.xlu0 %v2366_v54 }
0x1186   : > { %v2368_v55 = vpop.xlane.xlu0 %2367 }
0x1187   : > { %v2369_v56 = vmul.f32 0.03125, %v2368_v55 }
0x1189   : > { %v2370_v57 = vsub.f32 %v2363_v53, %v2369_v56 }
0x118b   : > { %v2371_v58 = vmul.f32 %v2370_v57, %v2370_v57 }
0x118d   : > { %v2372_v59 = vsel %vm913_vm1, %v2371_v58, 0.0 }
0x118e   : > { %2373 = vadd.xlane.f32.xlu1 %v2372_v59 }
0x121b   : > { %v2374_v60 = vpop.xlane.xlu1 %2373 }
0x121c   : > { %v2375_v61 = vmul.f32 0.03125, %v2374_v60 }
0x121e   : > { %v2376_v62 = vadd.f32 1e-05, %v2375_v61 }
0x1220   : > { %3092 = vrsqrt.f32 %v2376_v62 }
0x122a   : > { %v3093_v63 = vpop.eup %3092 }
0x122b   : > { %v2378_v2 = vmul.f32 %v3093_v63, %v2370_v57 }
0x122d   : > { %v2385_v5 = vmul.f32 %v2667_v1, %v2378_v2 }
0x122f   : > { %v2392_v6 = vadd.f32 %v2668_v4, %v2385_v5 }
0x1231   : > { %2393 = vst.msk [vmem:[%s874_s2] sm:$0xff] %vm913_vm1, %v2392_v6 }
0x1232   : > { %3389 = shalt.err (!%p3386_p5)
}
0x1233   : > { %s3390_s9 = scalar_lea.hbm %s4225_s12, 128  ;;  %s3394_s1 = scalar_lea.hbm %s4388_s10, 256 }
0x1234   : > { %p3391_p9 = scmp.ne.s32.totalorder %s4225_s12, %s3390_s9  ;;  %p3395_p12 = scmp.lt.u32.totalorder %s4225_s12, %s4388_s10 }
0x1235   : > { %p3396_p1 = scmp.lt.u32.totalorder %s3394_s1, %s3390_s9  ;;  %p3398_p0 = scmp.lt.u32.totalorder %s3390_s9, %s4225_s12 }
0x1236   : > { %p3392_p7 = pnand %p3391_p9, %p4389_p2 }
0x1237   : > { %p3397_p13 = por %p3396_p1, %p3395_p12 }
0x1238   : > { %p3393_p4 = pneg %p3392_p7 }
0x1239   : > { %p3399_p3 = por %p3398_p0, %p3397_p13 }
0x123b   : > { %p3400_p6 = pnand %p3399_p3, %p3393_p4 }
0x123d   : > { %3403 = shalt.err (!%p3400_p6)
}
0x123e   : > { %2923 = dma.vmem_to_hbm [thread:$0]  (%p4389_p2), %s4227_s0, 128, %s4225_s12, %s2395_s23  }
0x123f PF: > { %s2420_s16 = sand.u32 1, %s3450_s4   ;;  %p4390_p10 = scmp.ne.s32.totalorder %s4354_s21, 0 }
0x1240   : > { %p4391_p11 = scmp.ge.s32.totalorder %s3462_s25, 2  ;;  %s2421_s2 = scalar_lea.sflag [#allocation5], %s2420_s16 }
0x1242   : > { %p2958_p8 = pnand %p4391_p11, %p4390_p10 }
0x1244   : > { %3445 = dma.done.wait (!%p2958_p8), %s2421_s2, 128  }
0x1245   : > { %3447 = vsyncadd (!%p2958_p8), %s2421_s2, 4294967168  ;;  %p41_p5 = scmp.ge.s32.totalorder %s3857_s7, 4   ;;  %s4392_s4 = smov %s3454_s30 }
0x1246   : > { %s4393_s30 = smov %s3458_s24  ;;  %s4394_s24 = smov %s3869_s28 }
0x1247   : > { %s4395_s25 = smov %s3857_s7  ;;  %43 = sbr.rel (!%p41_p5) target bundleno = 33 (0x21), region = 199 }
0x124e   :  { %2426 = vsyncpa [#allocation4], 1 }
0x124f   :  { %2428 = vsyncpa [#allocation4 + $0x1], 1 }
0x1250   :  { %2429 = vsyncpa [#allocation7], 1 }
0x1251   :  { %2430 = vsyncpa [#allocation10], 1 }
0x1252   :  { %2431 = vsyncpa [#allocation13], 1 }
0x1253   :  { %2432 = vsyncpa [#allocation16], 1 }
0x1254   :  { %2433 = vsyncpa [#allocation19], 1 }
0x1255   :  { %2434 = vsyncpa [#allocation5], 1 }
0x1256   :  { %2436 = vsyncpa [#allocation5 + $0x1], 1 }

</bundles_post_ra>
